<compile_context>
chip_gen: v6e
topology: v6e:2x2x1
jax: 0.10.0
libtpu: 0.0.40
codegen_flags: <defaults>
</compile_context>

<pallas_src>
import functools

import jax
import jax.numpy as jnp
from jax.experimental import pallas as pl
from jax.experimental.pallas import tpu as pltpu


# ---------------------------------------------------------------------------
# Small helpers: chip budgets, tile sizing, VMEM guard
# ---------------------------------------------------------------------------
def _round_up(x, m):
    return ((x + m - 1) // m) * m


def _tpu_budgets():
    """(target_block_bytes, vmem_limit_bytes, min_grid_steps) for this chip."""
    kind = ""
    try:
        kind = jax.devices()[0].device_kind.lower()
    except Exception:  # defensive: keep trace-time code from ever failing here
        pass
    if "v5" in kind:
        return 2 * 1024 * 1024, 32 * 1024 * 1024, 1   # 1 TC, 128 MiB physical VMEM
    if "v6" in kind:
        return 8 * 1024 * 1024, 64 * 1024 * 1024, 1   # 1 TC, 128 MiB physical VMEM
    if "v7" in kind:
        return 5 * 1024 * 1024, 48 * 1024 * 1024, 2   # 2 TCs, 64 MiB physical VMEM
    return 4 * 1024 * 1024, 48 * 1024 * 1024, 2       # conservative: safe everywhere


def _sublane_multiple(dtype):
    # Sub-32-bit dtypes pack rows along sublanes: 8 (f32), 16 (bf16), 32 (i8/fp8).
    return max(8, 32 // max(1, jnp.dtype(dtype).itemsize))


def _choose_b_tile(B, row_bytes, dtype, target_block_bytes, min_grid_steps):
    """Batch tile: multiple of the dtype's sublane packing, sized to roughly
    `target_block_bytes` for the largest stream, capped so the grid has at
    least `min_grid_steps` steps (so both v7x TensorCores get work)."""
    sub = _sublane_multiple(dtype)
    if B <= sub:
        return int(B)                     # full dim -> no (8,128) constraint
    rows = max(sub, target_block_bytes // max(1, row_bytes))
    rows = (rows // sub) * sub
    if min_grid_steps >= 2 and B >= 2 * sub:
        rows = min(rows, max(sub, ((B // 2) // sub) * sub))
    rows = min(rows, _round_up(B, sub))
    return int(max(sub, rows))


def _check_vmem(tag, block_bytes_all_streams, vmem_limit_bytes):
    need = 2 * block_bytes_all_streams    # double-buffered pipeline
    if need > vmem_limit_bytes:
        # TODO(synk): for very long domains add a second grid axis over N with a
        # one-tile halo instead of refusing; for now fail loudly rather than OOM.
        raise ValueError(
            f"{tag}: double-buffered blocks need ~{need} B of VMEM "
            f"(> scoped limit {vmem_limit_bytes} B); reduce b_tile or tile N.")


# ---------------------------------------------------------------------------
# Kernels
# ---------------------------------------------------------------------------
def _lwr_drho_dt_kernel(inv_dx_ref, rho_ref, u_ref, out_ref, *, n_last):
    """drho/dt = -d(rho*u)/dx on a lane-aligned [b_tile, Np] slab (Np % 128 == 0).

    Both rolls read `f` (independent -> can co-issue on the two XLU pipes).
    Column `n_last` (last *real* column) gets the replicate-padded value
    f[n_last] - f[n_last-1]; columns beyond n_last are padding and are sliced
    off by the wrapper.
    """
    inv_dx = inv_dx_ref[0]
    rho = rho_ref[...].astype(jnp.float32)
    u = u_ref[...].astype(jnp.float32)
    f = rho * u                                      # LWR flux f(rho) = rho * u
    n = f.shape[-1]
    f_next = pltpu.roll(f, shift=n - 1, axis=1)      # f_next[i] = f[(i + 1) % n]
    f_prev = pltpu.roll(f, shift=1, axis=1)          # f_prev[i] = f[(i - 1) % n]
    lane = jax.lax.broadcasted_iota(jnp.int32, f.shape, dimension=1)
    diff = jnp.where(lane == n_last, f - f_prev, f_next - f)
    out_ref[...] = (-(diff * inv_dx)).astype(out_ref.dtype)


def _lwr_mu_fused_kernel(inv_dx_ref, mu_ref, out_ref):
    """Fused forward: [b_tile, N, F] -> [b_tile, N, 2].

    Channel extraction and the stack with the identically-zero du/dt channel
    happen here, so there is no wrapper-side slice/stack HBM traffic.
    """
    inv_dx = inv_dx_ref[0]
    mu = mu_ref[...]
    rho = mu[:, :, 0:1].astype(jnp.float32)          # [b, N, 1]
    u = mu[:, :, 1:2].astype(jnp.float32)            # [b, N, 1]
    f = rho * u
    df = (f[:, 1:, :] - f[:, :-1, :]) * inv_dx       # forward difference along x
    df = jnp.concatenate([df, df[:, -1:, :]], axis=1)  # replicate pad -> [b, N, 1]
    chan = jax.lax.broadcasted_iota(jnp.int32, out_ref.shape, dimension=2)
    out_ref[...] = jnp.where(chan == 0, -df, 0.0).astype(out_ref.dtype)


# ---------------------------------------------------------------------------
# Wrappers
# ---------------------------------------------------------------------------
def lwr_drho_dt(rho, u, dx=50.0, *, b_tile=None,
                target_block_bytes=None, vmem_limit_bytes=None):
    """Channel-major fast path: rho, u [B, N] -> drho/dt [B, N] (rho.dtype).

    Preferred entry when the surrounding model keeps rho/u as separate arrays.
    N is zero-padded to a multiple of 128 (output sliced back) so every tile
    takes the lane-dense roll path with unmasked stores.
    """
    assert rho.shape == u.shape and rho.ndim == 2
    B, N = rho.shape
    assert N >= 2, "need at least two cells for a forward difference"
    out_dtype = rho.dtype
    itemsize = jnp.dtype(rho.dtype).itemsize

    blk_default, vmem_default, min_grid = _tpu_budgets()
    target_block_bytes = blk_default if target_block_bytes is None else target_block_bytes
    vmem_limit_bytes = vmem_default if vmem_limit_bytes is None else vmem_limit_bytes

    # Lane-align the spatial axis; the last real column is fixed up in-kernel
    # via the static n_last, padding columns are sliced off below.
    Np = _round_up(N, 128)
    if Np != N:
        rho = jnp.pad(rho, ((0, 0), (0, Np - N)))
        u = jnp.pad(u, ((0, 0), (0, Np - N)))

    row_bytes = Np * itemsize
    if b_tile is None:
        b_tile = _choose_b_tile(B, row_bytes, out_dtype, target_block_bytes, min_grid)
    b_tile = max(1, min(int(b_tile), B))
    _check_vmem("lwr_drho_dt", 3 * b_tile * row_bytes, vmem_limit_bytes)

    grid = (pl.cdiv(B, b_tile),)
    inv_dx = (1.0 / jnp.asarray(dx, jnp.float32)).reshape(1)
    blk = pl.BlockSpec((b_tile, Np), lambda i: (i, 0))

    out = pl.pallas_call(
        functools.partial(_lwr_drho_dt_kernel, n_last=N - 1),
        out_shape=jax.ShapeDtypeStruct((B, Np), out_dtype),
        grid=grid,
        in_specs=[
            pl.BlockSpec(memory_space=pltpu.MemorySpace.SMEM),   # 1/dx scalar
            blk,                                                 # rho
            blk,                                                 # u
        ],
        out_specs=blk,
        compiler_params=pltpu.CompilerParams(
            dimension_semantics=("parallel",),   # batch tiles are independent
            vmem_limit_bytes=int(vmem_limit_bytes),
        ),
        cost_estimate=pl.CostEstimate(
            flops=int(4 * B * Np), transcendentals=0,
            bytes_accessed=int(3 * B * Np * itemsize)),
    )(inv_dx, rho, u)

    return out if Np == N else out[:, :N]


def stochastic_lwr_forward(mu, dx=50.0, *, b_tile=None,
                           target_block_bytes=None, vmem_limit_bytes=None):
    """PyTorch-compatible forward: mu [B, N, F] (F >= 2) -> [B, N, 2].

    The slices mu[...,0]/mu[...,1] and the stack with the zero du/dt channel
    are fused into the kernel (no wrapper glue around the pallas_call).
    """
    assert mu.ndim == 3 and mu.shape[-1] >= 2
    B, N, F = mu.shape
    assert N >= 2
    itemsize = jnp.dtype(mu.dtype).itemsize

    blk_default, vmem_default, min_grid = _tpu_budgets()
    target_block_bytes = blk_default if target_block_bytes is None else target_block_bytes
    vmem_limit_bytes = vmem_default if vmem_limit_bytes is None else vmem_limit_bytes

    # With [.., N, F] blocks, N sits on sublanes and F on lanes; the minor dim
    # is padded to 128 lanes in VMEM, so size the batch tile on that footprint.
    in_row = _round_up(N, 8) * _round_up(max(F, 2), 128) * itemsize
    out_row = _round_up(N, 8) * 128 * itemsize
    if b_tile is None:
        b_tile = _choose_b_tile(B, in_row, mu.dtype, target_block_bytes, min_grid)
    b_tile = max(1, min(int(b_tile), B))
    _check_vmem("stochastic_lwr_forward", b_tile * (in_row + out_row), vmem_limit_bytes)

    grid = (pl.cdiv(B, b_tile),)
    inv_dx = (1.0 / jnp.asarray(dx, jnp.float32)).reshape(1)

    return pl.pallas_call(
        _lwr_mu_fused_kernel,
        out_shape=jax.ShapeDtypeStruct((B, N, 2), mu.dtype),
        grid=grid,
        in_specs=[
            pl.BlockSpec(memory_space=pltpu.MemorySpace.SMEM),        # 1/dx
            pl.BlockSpec((b_tile, N, F), lambda i: (i, 0, 0)),        # mu block
        ],
        out_specs=pl.BlockSpec((b_tile, N, 2), lambda i: (i, 0, 0)),
        compiler_params=pltpu.CompilerParams(
            dimension_semantics=("parallel",),
            vmem_limit_bytes=int(vmem_limit_bytes),
        ),
        cost_estimate=pl.CostEstimate(
            flops=int(4 * B * N), transcendentals=0,
            bytes_accessed=int((F + 2) * B * N * itemsize)),
    )(inv_dx, mu)


# ---------------------------------------------------------------------------
# Pure-JAX reference + self-test
# ---------------------------------------------------------------------------
def _reference(mu, dx=50.0):
    rho = mu[:, :, 0]
    u = mu[:, :, 1]
    f = rho * u
    df_dx = (f[:, 1:] - f[:, :-1]) / dx
    df_dx = jnp.concatenate([df_dx, df_dx[:, -1:]], axis=1)   # replicate pad
    return jnp.stack([-df_dx, jnp.zeros_like(u)], axis=-1)


if __name__ == "__main__":
    key = jax.random.PRNGKey(0)
    dx = 50.0
    k1, k2, k3, k4 = jax.random.split(key, 4)

    # 1) PyTorch-style interface, fused kernel: [B, N, F] -> [B, N, 2].
    B, N, F = 4, 128, 4
    rho = jax.random.uniform(k1, (B, N), jnp.float32, minval=0.0, maxval=1.0)
    u = jax.random.uniform(k2, (B, N), jnp.float32, minval=0.0, maxval=30.0)
    extra = jax.random.normal(k3, (B, N, F - 2), jnp.float32)
    mu = jnp.concatenate([rho[..., None], u[..., None], extra], axis=-1)

    out = jax.block_until_ready(stochastic_lwr_forward(mu, dx=dx))
    assert out.shape == (B, N, 2), out.shape
    assert jnp.allclose(out, _reference(mu, dx), atol=1e-5, rtol=1e-5), "fused mismatch"

    # 2) Small F=2 case through the fused kernel.
    mu_small = jax.random.uniform(k4, (2, 16, 2), jnp.float32, minval=0.0, maxval=5.0)
    out_small = jax.block_until_ready(stochastic_lwr_forward(mu_small, dx=dx))
    assert jnp.allclose(out_small, _reference(mu_small, dx), atol=1e-5, rtol=1e-5), \
        "fused small mismatch"

    # 3) Channel-major fast path, lane-aligned N (roll path, multi-tile grid).
    B2, N2 = 16, 128
    rho2 = jax.random.uniform(k3, (B2, N2), jnp.float32, minval=0.0, maxval=1.0)
    u2 = jax.random.uniform(k4, (B2, N2), jnp.float32, minval=0.0, maxval=30.0)
    d2 = jax.block_until_ready(lwr_drho_dt(rho2, u2, dx))
    ref2 = _reference(jnp.stack([rho2, u2], axis=-1), dx)[..., 0]
    assert jnp.allclose(d2, ref2, atol=1e-5, rtol=1e-5), "channel-major mismatch"

    # 4) Non-lane-aligned N: padded to 128 inside the wrapper, sliced back.
    rho3, u3 = rho2[:, :96], u2[:, :96]
    d3 = jax.block_until_ready(lwr_drho_dt(rho3, u3, dx))
    ref3 = _reference(jnp.stack([rho3, u3], axis=-1), dx)[..., 0]
    assert jnp.allclose(d3, ref3, atol=1e-5, rtol=1e-5), "padded-N mismatch"

    print("KERNEL_OK")
</pallas_src>

<mosaic_0001>
module attributes {stable_mosaic.version = 11 : i64} {
  func.func @_lwr_mu_fused_kernel(%arg0: i32, %arg1: memref<1xf32, #tpu.memory_space<smem>>, %arg2: memref<4x128x4xf32, #tpu.memory_space<vmem>>, %arg3: memref<4x128x2xf32, #tpu.memory_space<vmem>>) attributes {dimension_semantics = [#tpu.dimension_semantics<parallel>], iteration_bounds = array<i64: 1>, scalar_prefetch = 0 : i64, scratch_operands = 0 : i64, tpu.core_type = #tpu.core_type<tc>, window_params = [{transform_indices = @transform_0, window_bounds = array<i64: 1>}, {transform_indices = @transform_1, window_bounds = array<i64: 4, 128, 4>}, {transform_indices = @transform_2, window_bounds = array<i64: 4, 128, 2>}]} {
    %c0 = arith.constant 0 : index
    %0 = memref.load %arg1[%c0] : memref<1xf32, #tpu.memory_space<smem>>
    %c0_0 = arith.constant 0 : index
    %c0_1 = arith.constant 0 : index
    %c0_2 = arith.constant 0 : index
    %1 = vector.load %arg2[%c0_0, %c0_1, %c0_2] : memref<4x128x4xf32, #tpu.memory_space<vmem>>, vector<4x128x4xf32>
    %2 = vector.extract_strided_slice %1 {offsets = [0, 0, 0], sizes = [4, 128, 1], strides = [1, 1, 1]} : vector<4x128x4xf32> to vector<4x128x1xf32>
    %3 = vector.extract_strided_slice %1 {offsets = [0, 0, 1], sizes = [4, 128, 1], strides = [1, 1, 1]} : vector<4x128x4xf32> to vector<4x128x1xf32>
    %4 = arith.mulf %2, %3 : vector<4x128x1xf32>
    %5 = vector.extract_strided_slice %4 {offsets = [0, 1, 0], sizes = [4, 127, 1], strides = [1, 1, 1]} : vector<4x128x1xf32> to vector<4x127x1xf32>
    %6 = vector.extract_strided_slice %4 {offsets = [0, 0, 0], sizes = [4, 127, 1], strides = [1, 1, 1]} : vector<4x128x1xf32> to vector<4x127x1xf32>
    %7 = arith.subf %5, %6 : vector<4x127x1xf32>
    %8 = vector.broadcast %0 : f32 to vector<4x127x1xf32>
    %9 = arith.mulf %7, %8 : vector<4x127x1xf32>
    %10 = vector.extract_strided_slice %9 {offsets = [0, 126, 0], sizes = [4, 1, 1], strides = [1, 1, 1]} : vector<4x127x1xf32> to vector<4x1x1xf32>
    %11 = tpu.concatenate %9, %10 in 1 : vector<4x127x1xf32>, vector<4x1x1xf32> -> vector<4x128x1xf32>
    %12 = tpu.iota {dimensions = array<i32: 2>} : vector<4x128x2xi32>
    %c0_i32 = arith.constant 0 : i32
    %13 = vector.broadcast %c0_i32 : i32 to vector<4x128x2xi32>
    %14 = arith.cmpi eq, %12, %13 : vector<4x128x2xi32>
    %cst = arith.constant 0.000000e+00 : f32
    %15 = vector.broadcast %cst : f32 to vector<4x128x1xf32>
    %16 = arith.subf %15, %11 : vector<4x128x1xf32>
    %cst_3 = arith.constant 0.000000e+00 : f32
    %17 = vector.shape_cast %16 : vector<4x128x1xf32> to vector<4x128x1xf32>
    %18 = vector.broadcast %17 : vector<4x128x1xf32> to vector<4x128x2xf32>
    %19 = vector.broadcast %cst_3 : f32 to vector<4x128x2xf32>
    %20 = arith.select %14, %18, %19 : vector<4x128x2xi1>, vector<4x128x2xf32>
    %c0_4 = arith.constant 0 : index
    %c0_5 = arith.constant 0 : index
    %c0_6 = arith.constant 0 : index
    %21 = vector.load %arg3[%c0_4, %c0_5, %c0_6] : memref<4x128x2xf32, #tpu.memory_space<vmem>>, vector<4x128x2xf32>
    tpu.vector_store %arg3[%c0_4, %c0_5, %c0_6], %20 {strides = array<i32>} : memref<4x128x2xf32, #tpu.memory_space<vmem>>, vector<4x128x2xf32>,
    return
  }
  func.func @transform_0(%arg0: i32) -> i32 {
    %c0_i32 = arith.constant 0 : i32
    %c0_i32_0 = arith.constant 0 : i32
    return %c0_i32 : i32
  }
  func.func @transform_1(%arg0: i32) -> (i32, i32, i32) {
    %c0_i32 = arith.constant 0 : i32
    %c0_i32_0 = arith.constant 0 : i32
    %c0_i32_1 = arith.constant 0 : i32
    return %arg0, %c0_i32, %c0_i32_0 : i32, i32, i32
  }
  func.func @transform_2(%arg0: i32) -> (i32, i32, i32) {
    %c0_i32 = arith.constant 0 : i32
    %c0_i32_0 = arith.constant 0 : i32
    %c0_i32_1 = arith.constant 0 : i32
    return %arg0, %c0_i32, %c0_i32_0 : i32, i32, i32
  }
}

</mosaic_0001>

<bundles_post_ra>
// kernel: tpu_custom_call.1
= control target key start
LH: loop header
LB: loop body
LE: loop exit
PB: predicated region body
PF: predicated region fallthrough
CT: control target
= control target key end

     0   :  { %s1570_s13 = smov 127   ;;  %v1571_v6 = vmov 0   ;;  %vm461_vm0 = vcmask 1040384   ;;  %vm843_vm1 = vcmask 1046528   ;;  %vm1487_vm3 = vcmask 15360   ;;  %s2681_s1 = inlined_call_operand.vmem [shape: f32[4,128,4], index: 1, kind: input, shape index: {}]   ;;  %s2682_s0 = inlined_call_operand.<no memory space> [shape: f32[1], index: 0, kind: input, shape index: {}]   ;;  %s2683_s2 = inlined_call_operand.vmem [shape: f32[4,128,2], index: 2, kind: output, shape index: {}]  }
   0x1   :  { %v1590_v0 = vld [vmem:[%s2681_s1 + $0x10] sm:$0xff]  ;;  %v1595_v1 = vld [vmem:[%s2681_s1] sm:$0xff]  ;;  %v1604_v2 = vld [vmem:[%s2681_s1 + $0x18] sm:$0xff]  ;;  %1559 = vset.pattern.permute.xlu1 %v1571_v6  ;;  %1558 = vset.pattern.permute.xlu0 %v1571_v6 }
   0x2   :  { %145 = vrot.lane.b32.xlu1 %v1590_v0, %s1570_s13  ;;  %141 = vrot.lane.b32.xlu0 %v1595_v1, %s1570_s13  ;;  %v1609_v3 = vld [vmem:[%s2681_s1 + $0x8] sm:$0xff]  ;;  %v1623_v5 = vld [vmem:[%s2681_s1 + $0x20] sm:$0xff] }
   0x3   :  { %v1618_v4 = vld [vmem:[%s2681_s1 + $0x28] sm:$0xff]  ;;  %v1632_v7 = vld [vmem:[%s2681_s1 + $0x38] sm:$0xff]  ;;  %v1637_v8 = vld [vmem:[%s2681_s1 + $0x30] sm:$0xff] }
   0x4   :  { %v1646_v9 = vld [vmem:[%s2681_s1 + $0x48] sm:$0xff]  ;;  %v1651_v10 = vld [vmem:[%s2681_s1 + $0x40] sm:$0xff]  ;;  %v1660_v11 = vld [vmem:[%s2681_s1 + $0x58] sm:$0xff] }
   0x5   :  { %v1665_v12 = vld [vmem:[%s2681_s1 + $0x50] sm:$0xff]  ;;  %v1674_v13 = vld [vmem:[%s2681_s1 + $0x68] sm:$0xff]  ;;  %v1679_v14 = vld [vmem:[%s2681_s1 + $0x60] sm:$0xff] }
   0x6   :  { %147 = vrot.lane.b32.xlu1 %v1604_v2, %s1570_s13  ;;  %143 = vrot.lane.b32.xlu0 %v1609_v3, %s1570_s13  ;;  %v1688_v15 = vld [vmem:[%s2681_s1 + $0x78] sm:$0xff]  ;;  %v1693_v16 = vld [vmem:[%s2681_s1 + $0x70] sm:$0xff] }
   0x7   :  { %v1702_v17 = vld [vmem:[%s2681_s1 + $0x88] sm:$0xff]  ;;  %v1707_v18 = vld [vmem:[%s2681_s1 + $0x80] sm:$0xff]  ;;  %v1716_v19 = vld [vmem:[%s2681_s1 + $0x98] sm:$0xff] }
   0x8   :  { %v1721_v20 = vld [vmem:[%s2681_s1 + $0x90] sm:$0xff]  ;;  %v1730_v21 = vld [vmem:[%s2681_s1 + $0xa8] sm:$0xff]  ;;  %v1735_v22 = vld [vmem:[%s2681_s1 + $0xa0] sm:$0xff] }
   0x9   :  { %v1744_v23 = vld [vmem:[%s2681_s1 + $0xb8] sm:$0xff]  ;;  %v1749_v24 = vld [vmem:[%s2681_s1 + $0xb0] sm:$0xff]  ;;  %v1758_v25 = vld [vmem:[%s2681_s1 + $0xc8] sm:$0xff] }
   0xa   :  { %151 = vrot.lane.b32.xlu1 %v1618_v4, %s1570_s13  ;;  %149 = vrot.lane.b32.xlu0 %v1623_v5, %s1570_s13  ;;  %v1763_v26 = vld [vmem:[%s2681_s1 + $0xc0] sm:$0xff]  ;;  %v1772_v27 = vld [vmem:[%s2681_s1 + $0xd8] sm:$0xff] }
   0xb   :  { %v1777_v28 = vld [vmem:[%s2681_s1 + $0xd0] sm:$0xff]  ;;  %v1786_v29 = vld [vmem:[%s2681_s1 + $0xe8] sm:$0xff]  ;;  %v1791_v30 = vld [vmem:[%s2681_s1 + $0xe0] sm:$0xff] }
   0xc   :  { %v1800_v31 = vld [vmem:[%s2681_s1 + $0xf8] sm:$0xff]  ;;  %v1805_v32 = vld [vmem:[%s2681_s1 + $0xf0] sm:$0xff]  ;;  %v1814_v33 = vld [vmem:[%s2681_s1 + $0x108] sm:$0xff] }
   0xd   :  { %v1819_v34 = vld [vmem:[%s2681_s1 + $0x100] sm:$0xff]  ;;  %v1828_v35 = vld [vmem:[%s2681_s1 + $0x118] sm:$0xff]  ;;  %v1833_v36 = vld [vmem:[%s2681_s1 + $0x110] sm:$0xff] }
   0xe   :  { %155 = vrot.lane.b32.xlu1 %v1632_v7, %s1570_s13  ;;  %153 = vrot.lane.b32.xlu0 %v1637_v8, %s1570_s13  ;;  %v1842_v37 = vld [vmem:[%s2681_s1 + $0x128] sm:$0xff]  ;;  %v1847_v38 = vld [vmem:[%s2681_s1 + $0x120] sm:$0xff] }
   0xf   :  { %v1856_v39 = vld [vmem:[%s2681_s1 + $0x138] sm:$0xff]  ;;  %v1861_v40 = vld [vmem:[%s2681_s1 + $0x130] sm:$0xff]  ;;  %v1870_v41 = vld [vmem:[%s2681_s1 + $0x148] sm:$0xff] }
  0x10   :  { %v1875_v42 = vld [vmem:[%s2681_s1 + $0x140] sm:$0xff]  ;;  %v1884_v43 = vld [vmem:[%s2681_s1 + $0x158] sm:$0xff]  ;;  %v1889_v44 = vld [vmem:[%s2681_s1 + $0x150] sm:$0xff] }
  0x11   :  { %2695 = vst [vmem:[#allocation3_spill] sm:$0xff] %v1889_v44  ;;  %v1898_v45 = vld [vmem:[%s2681_s1 + $0x168] sm:$0xff]  ;;  %v1903_v46 = vld [vmem:[%s2681_s1 + $0x160] sm:$0xff]  ;;  %v1912_v47 = vld [vmem:[%s2681_s1 + $0x178] sm:$0xff] }
  0x12   :  { %159 = vrot.lane.b32.xlu1 %v1646_v9, %s1570_s13  ;;  %157 = vrot.lane.b32.xlu0 %v1651_v10, %s1570_s13  ;;  %2696 = vst [vmem:[#allocation4_spill] sm:$0xff] %v1898_v45  ;;  %2697 = vst [vmem:[#allocation5_spill] sm:$0xff] %v1903_v46  ;;  %v1917_v48 = vld [vmem:[%s2681_s1 + $0x170] sm:$0xff]  ;;  %v1926_v49 = vld [vmem:[%s2681_s1 + $0x188] sm:$0xff] }
  0x13   :  { %2698 = vst [vmem:[#allocation6_spill] sm:$0xff] %v1912_v47  ;;  %2699 = vst [vmem:[#allocation7_spill] sm:$0xff] %v1917_v48  ;;  %v1931_v50 = vld [vmem:[%s2681_s1 + $0x180] sm:$0xff]  ;;  %v1940_v51 = vld [vmem:[%s2681_s1 + $0x198] sm:$0xff] }
  0x14   :  { %2700 = vst [vmem:[#allocation8_spill] sm:$0xff] %v1926_v49  ;;  %2701 = vst [vmem:[#allocation9_spill] sm:$0xff] %v1931_v50  ;;  %v1945_v52 = vld [vmem:[%s2681_s1 + $0x190] sm:$0xff]  ;;  %v1954_v53 = vld [vmem:[%s2681_s1 + $0x1a8] sm:$0xff] }
  0x15   :  { %2702 = vst [vmem:[#allocation10_spill] sm:$0xff] %v1940_v51  ;;  %2703 = vst [vmem:[#allocation11_spill] sm:$0xff] %v1945_v52  ;;  %v1959_v54 = vld [vmem:[%s2681_s1 + $0x1a0] sm:$0xff]  ;;  %v68_v55 = vld [vmem:[%s2681_s1 + $0x1b8] sm:$0xff] }
  0x16   :  { %163 = vrot.lane.b32.xlu1 %v1660_v11, %s1570_s13  ;;  %161 = vrot.lane.b32.xlu0 %v1665_v12, %s1570_s13  ;;  %2704 = vst [vmem:[#allocation12_spill] sm:$0xff] %v1954_v53  ;;  %2705 = vst [vmem:[#allocation13_spill] sm:$0xff] %v1959_v54  ;;  %v67_v56 = vld [vmem:[%s2681_s1 + $0x1b0] sm:$0xff]  ;;  %v70_v57 = vld [vmem:[%s2681_s1 + $0x1c8] sm:$0xff] }
  0x17   :  { %v69_v58 = vld [vmem:[%s2681_s1 + $0x1c0] sm:$0xff]  ;;  %v72_v59 = vld [vmem:[%s2681_s1 + $0x1d8] sm:$0xff]  ;;  %v71_v60 = vld [vmem:[%s2681_s1 + $0x1d0] sm:$0xff] }
  0x1a   :  { %167 = vrot.lane.b32.xlu1 %v1674_v13, %s1570_s13  ;;  %165 = vrot.lane.b32.xlu0 %v1679_v14, %s1570_s13 }
  0x1e   :  { %171 = vrot.lane.b32.xlu1 %v1688_v15, %s1570_s13  ;;  %169 = vrot.lane.b32.xlu0 %v1693_v16, %s1570_s13 }
  0x22   :  { %175 = vrot.lane.b32.xlu1 %v1702_v17, %s1570_s13  ;;  %173 = vrot.lane.b32.xlu0 %v1707_v18, %s1570_s13 }
  0x26   :  { %179 = vrot.lane.b32.xlu1 %v1716_v19, %s1570_s13  ;;  %177 = vrot.lane.b32.xlu0 %v1721_v20, %s1570_s13 }
  0x2a   :  { %183 = vrot.lane.b32.xlu1 %v1730_v21, %s1570_s13  ;;  %181 = vrot.lane.b32.xlu0 %v1735_v22, %s1570_s13 }
  0x2e   :  { %187 = vrot.lane.b32.xlu1 %v1744_v23, %s1570_s13  ;;  %185 = vrot.lane.b32.xlu0 %v1749_v24, %s1570_s13 }
  0x32   :  { %191 = vrot.lane.b32.xlu1 %v1758_v25, %s1570_s13  ;;  %189 = vrot.lane.b32.xlu0 %v1763_v26, %s1570_s13 }
  0x36   :  { %195 = vrot.lane.b32.xlu1 %v1772_v27, %s1570_s13  ;;  %193 = vrot.lane.b32.xlu0 %v1777_v28, %s1570_s13 }
  0x3a   :  { %199 = vrot.lane.b32.xlu1 %v1786_v29, %s1570_s13  ;;  %197 = vrot.lane.b32.xlu0 %v1791_v30, %s1570_s13 }
  0x3e   :  { %203 = vrot.lane.b32.xlu1 %v1800_v31, %s1570_s13  ;;  %201 = vrot.lane.b32.xlu0 %v1805_v32, %s1570_s13 }
  0x42   :  { %207 = vrot.lane.b32.xlu1 %v1814_v33, %s1570_s13  ;;  %205 = vrot.lane.b32.xlu0 %v1819_v34, %s1570_s13 }
  0x46   :  { %211 = vrot.lane.b32.xlu1 %v1828_v35, %s1570_s13  ;;  %209 = vrot.lane.b32.xlu0 %v1833_v36, %s1570_s13 }
  0x4a   :  { %215 = vrot.lane.b32.xlu1 %v1842_v37, %s1570_s13  ;;  %213 = vrot.lane.b32.xlu0 %v1847_v38, %s1570_s13 }
  0x4e   :  { %219 = vrot.lane.b32.xlu1 %v1856_v39, %s1570_s13  ;;  %217 = vrot.lane.b32.xlu0 %v1861_v40, %s1570_s13 }
  0x52   :  { %223 = vrot.lane.b32.xlu1 %v1870_v41, %s1570_s13  ;;  %221 = vrot.lane.b32.xlu0 %v1875_v42, %s1570_s13 }
  0x56   :  { %227 = vrot.lane.b32.xlu1 %v1884_v43, %s1570_s13  ;;  %225 = vrot.lane.b32.xlu0 %v1889_v44, %s1570_s13 }
  0x5a   :  { %231 = vrot.lane.b32.xlu1 %v1898_v45, %s1570_s13  ;;  %229 = vrot.lane.b32.xlu0 %v1903_v46, %s1570_s13 }
  0x5e   :  { %235 = vrot.lane.b32.xlu1 %v1912_v47, %s1570_s13  ;;  %233 = vrot.lane.b32.xlu0 %v1917_v48, %s1570_s13 }
  0x62   :  { %239 = vrot.lane.b32.xlu1 %v1926_v49, %s1570_s13  ;;  %237 = vrot.lane.b32.xlu0 %v1931_v50, %s1570_s13 }
  0x66   :  { %243 = vrot.lane.b32.xlu1 %v1940_v51, %s1570_s13  ;;  %241 = vrot.lane.b32.xlu0 %v1945_v52, %s1570_s13 }
  0x6a   :  { %247 = vrot.lane.b32.xlu1 %v1954_v53, %s1570_s13  ;;  %245 = vrot.lane.b32.xlu0 %v1959_v54, %s1570_s13 }
  0x6e   :  { %251 = vrot.lane.b32.xlu1 %v68_v55, %s1570_s13  ;;  %249 = vrot.lane.b32.xlu0 %v67_v56, %s1570_s13  ;;  %v74_v56 = vld [vmem:[%s2681_s1 + $0x1e8] sm:$0xff] }
  0x72   :  { %255 = vrot.lane.b32.xlu1 %v70_v57, %s1570_s13  ;;  %253 = vrot.lane.b32.xlu0 %v69_v58, %s1570_s13  ;;  %v73_v57 = vld [vmem:[%s2681_s1 + $0x1e0] sm:$0xff] }
  0x74   :  { %v146_v61 = vpop.permute.xlu1 %145  ;;  %v142_v62 = vpop.permute.xlu0 %141 }
  0x75   :  { %v335_v63 = vmul.f32 %v146_v61, %v1590_v0  ;;  %v333_v6 = vmul.f32 %v142_v62, %v1595_v1  ;;  %v76_v62 = vld [vmem:[%s2681_s1 + $0x1f8] sm:$0xff] }
  0x76   :  { %259 = vrot.lane.b32.xlu1 %v72_v59, %s1570_s13  ;;  %257 = vrot.lane.b32.xlu0 %v71_v60, %s1570_s13  ;;  %v2002_v59 = vstv %s2682_s0 }
  0x77   :  { %v462_v55 = vrot.slane %v333_v6, 7  ;;  %v465_v53 = vrot.slane %v335_v63, 7 }
  0x78   :  { %v148_v58 = vpop.permute.xlu1 %147  ;;  %v144_v54 = vpop.permute.xlu0 %143 }
  0x79   :  { %v650_v52 = vsub.f32 %v333_v6, %v462_v55  ;;  %v336_v0 = vmul.f32 %v148_v58, %v1604_v2  ;;  %v334_v1 = vmul.f32 %v144_v54, %v1609_v3  ;;  %v75_v3 = vld [vmem:[%s2681_s1 + $0x1f0] sm:$0xff] }
  0x7a   :  { %263 = vrot.lane.b32.xlu1 %v74_v56, %s1570_s13  ;;  %261 = vrot.lane.b32.xlu0 %v73_v57, %s1570_s13 }
  0x7b   :  { %v467_v60 = vrot.slane %v336_v0, 7  ;;  %v463_v61 = vrot.slane %v334_v1, 7  ;;  %v715_v54 = vmul.f32 %v2002_v59, %v650_v52 }
  0x7c   :  { %v152_v6 = vpop.permute.xlu1 %151  ;;  %v150_v2 = vpop.permute.xlu0 %149 }
  0x7d   :  { %v468_v58 = vsel %vm461_vm0, %v465_v53, %v467_v60  ;;  %v464_v56 = vsel %vm461_vm0, %v462_v55, %v463_v61  ;;  %v466_v57 = vsel %vm461_vm0, %v463_v61, %v465_v53  ;;  %v338_v48 = vmul.f32 %v152_v6, %v1618_v4 }
  0x7e   :  { %v653_v51 = vsub.f32 %v336_v0, %v468_v58  ;;  %v651_v50 = vsub.f32 %v334_v1, %v464_v56  ;;  %v652_v49 = vsub.f32 %v335_v63, %v466_v57  ;;  %267 = vrot.lane.b32.xlu1 %v76_v62, %s1570_s13  ;;  %v337_v47 = vmul.f32 %v150_v2, %v1623_v5 }
  0x7f   :  { %265 = vrot.lane.b32.xlu0 %v75_v3, %s1570_s13  ;;  %v471_v45 = vrot.slane %v338_v48, 7  ;;  %v844_v1 = vrot.slane %v715_v54, 1 }
  0x80   :  { %v718_v46 = vmul.f32 %v2002_v59, %v653_v51  ;;  %v716_v52 = vmul.f32 %v2002_v59, %v651_v50  ;;  %v156_v44 = vpop.permute.xlu1 %155  ;;  %v154_v55 = vpop.permute.xlu0 %153  ;;  %v717_v53 = vmul.f32 %v2002_v59, %v652_v49  ;;  %v469_v0 = vrot.slane %v337_v47, 7 }
  0x81   :  { %v340_v63 = vmul.f32 %v156_v44, %v1632_v7  ;;  %v339_v4 = vmul.f32 %v154_v55, %v1637_v8 }
  0x82   :  { %v849_v61 = vrot.slane %v718_v46, 1  ;;  %v845_v5 = vrot.slane %v716_v52, 1  ;;  %v847_v62 = vrot.slane %v717_v53, 1  ;;  %v470_v6 = vsel %vm461_vm0, %v467_v60, %v469_v0 }
  0x83   :  { %v472_v51 = vsel %vm461_vm0, %v469_v0, %v471_v45  ;;  %v475_v50 = vrot.slane %v340_v63, 7  ;;  %v473_v2 = vrot.slane %v339_v4, 7  ;;  %v654_v3 = vsub.f32 %v337_v47, %v470_v6 }
  0x84   :  { %v655_v58 = vsub.f32 %v338_v48, %v472_v51  ;;  %v160_v56 = vpop.permute.xlu1 %159  ;;  %v158_v49 = vpop.permute.xlu0 %157  ;;  %v848_v57 = vsel %vm843_vm1, %v845_v5, %v847_v62  ;;  %v846_v7 = vsel %vm843_vm1, %v844_v1, %v845_v5  ;;  %v850_v6 = vsel %vm843_vm1, %v847_v62, %v849_v61 }
  0x85   :  { %v474_v8 = vsel %vm461_vm0, %v471_v45, %v473_v2  ;;  %v476_v44 = vsel %vm461_vm0, %v473_v2, %v475_v50  ;;  %v342_v46 = vmul.f32 %v160_v56, %v1646_v9  ;;  %v341_v60 = vmul.f32 %v158_v49, %v1651_v10 }
  0x86   :  { %v719_v54 = vmul.f32 %v2002_v59, %v654_v3  ;;  %v656_v52 = vsub.f32 %v339_v4, %v474_v8  ;;  %v657_v55 = vsub.f32 %v340_v63, %v476_v44  ;;  %v1040_v47 = vsub.f32 0.0, %v848_v57 }
  0x87   :  { %v479_v48 = vrot.slane %v342_v46, 7  ;;  %v477_v53 = vrot.slane %v341_v60, 7  ;;  %v1039_v0 = vsub.f32 0.0, %v846_v7  ;;  %v1041_v2 = vsub.f32 0.0, %v850_v6 }
  0x88   :  { %v851_v51 = vrot.slane %v719_v54, 1  ;;  %v721_v1 = vmul.f32 %v2002_v59, %v656_v52  ;;  %1110 = vperm.xlu1 %1559, %v1040_v47   ;;  %v164_v45 = vpop.permute.xlu1 %163  ;;  %v162_v5 = vpop.permute.xlu0 %161  ;;  %v720_v9 = vmul.f32 %v2002_v59, %v655_v58 }
  0x89   :  { %v478_v10 = vsel %vm461_vm0, %v475_v50, %v477_v53  ;;  %v480_v4 = vsel %vm461_vm0, %v477_v53, %v479_v48  ;;  %1105 = vperm.xlu0 %1558, %v1039_v0   ;;  %v2040_v63 = vmul.f32 %v164_v45, %v1660_v11  ;;  %v343_v3 = vmul.f32 %v162_v5, %v1665_v12 }
  0x8a   :  { %v855_v62 = vrot.slane %v721_v1, 1  ;;  %v658_v56 = vsub.f32 %v341_v60, %v478_v10  ;;  %v659_v49 = vsub.f32 %v342_v46, %v480_v4  ;;  %v852_v57 = vsel %vm843_vm1, %v849_v61, %v851_v51 }
  0x8b   :  { %v483_v7 = vrot.slane %v2040_v63, 7  ;;  %v481_v8 = vrot.slane %v343_v3, 7  ;;  %v1042_v44 = vsub.f32 0.0, %v852_v57  ;;  %v853_v58 = vrot.slane %v720_v9, 1 }
  0x8c   :  { %v723_v50 = vmul.f32 %v2002_v59, %v658_v56  ;;  %1115 = vperm.xlu1 %1559, %v1041_v2   ;;  %v168_v54 = vpop.permute.xlu1 %167  ;;  %v166_v52 = vpop.permute.xlu0 %165  ;;  %v722_v11 = vmul.f32 %v2002_v59, %v657_v55  ;;  %v724_v47 = vmul.f32 %v2002_v59, %v659_v49 }
  0x8d   :  { %v482_v12 = vsel %vm461_vm0, %v479_v48, %v481_v8  ;;  %v484_v46 = vsel %vm461_vm0, %v481_v8, %v483_v7  ;;  %1120 = vperm.xlu0 %1558, %v1042_v44   ;;  %v346_v61 = vmul.f32 %v168_v54, %v1674_v13  ;;  %v345_v60 = vmul.f32 %v166_v52, %v1679_v14 }
  0x8e   :  { %v859_v53 = vrot.slane %v723_v50, 1  ;;  %v660_v0 = vsub.f32 %v343_v3, %v482_v12  ;;  %v661_v6 = vsub.f32 %v2040_v63, %v484_v46  ;;  %v854_v1 = vsel %vm843_vm1, %v851_v51, %v853_v58 }
  0x8f   :  { %v487_v45 = vrot.slane %v346_v61, 7  ;;  %v485_v5 = vrot.slane %v345_v60, 7  ;;  %v1043_v55 = vsub.f32 0.0, %v854_v1  ;;  %v856_v2 = vsel %vm843_vm1, %v853_v58, %v855_v62 }
  0x90   :  { %v725_v48 = vmul.f32 %v2002_v59, %v660_v0  ;;  %v1044_v9 = vsub.f32 0.0, %v856_v2  ;;  %v172_v10 = vpop.permute.xlu1 %171  ;;  %v170_v4 = vpop.permute.xlu0 %169  ;;  %v857_v56 = vrot.slane %v722_v11, 1  ;;  %v861_v13 = vrot.slane %v724_v47, 1 }
  0x91   :  { %v486_v14 = vsel %vm461_vm0, %v483_v7, %v485_v5  ;;  %v488_v3 = vsel %vm461_vm0, %v485_v5, %v487_v45  ;;  %1125 = vperm.xlu1 %1559, %v1043_v55   ;;  %v348_v63 = vmul.f32 %v172_v10, %v1688_v15  ;;  %v347_v51 = vmul.f32 %v170_v4, %v1693_v16 }
  0x92   :  { %v863_v49 = vrot.slane %v725_v48, 1  ;;  %v662_v57 = vsub.f32 %v345_v60, %v486_v14  ;;  %v663_v8 = vsub.f32 %v346_v61, %v488_v3  ;;  %1130 = vperm.xlu0 %1558, %v1044_v9   ;;  %v858_v44 = vsel %vm843_vm1, %v855_v62, %v857_v56 }
  0x93   :  { %v491_v58 = vrot.slane %v348_v63, 7  ;;  %v489_v50 = vrot.slane %v347_v51, 7  ;;  %v1045_v54 = vsub.f32 0.0, %v858_v44  ;;  %v860_v52 = vsel %vm843_vm1, %v857_v56, %v859_v53 }
  0x94   :  { %v727_v7 = vmul.f32 %v2002_v59, %v662_v57  ;;  %v1046_v11 = vsub.f32 0.0, %v860_v52  ;;  %v176_v47 = vpop.permute.xlu1 %175  ;;  %v174_v12 = vpop.permute.xlu0 %173  ;;  %v862_v15 = vsel %vm843_vm1, %v859_v53, %v861_v13  ;;  %v864_v16 = vsel %vm843_vm1, %v861_v13, %v863_v49 }
  0x95   :  { %v490_v46 = vsel %vm461_vm0, %v487_v45, %v489_v50  ;;  %v492_v61 = vsel %vm461_vm0, %v489_v50, %v491_v58  ;;  %1135 = vperm.xlu1 %1559, %v1045_v54   ;;  %v350_v62 = vmul.f32 %v176_v47, %v1702_v17  ;;  %v349_v60 = vmul.f32 %v174_v12, %v1707_v18 }
  0x96   :  { %v664_v0 = vsub.f32 %v347_v51, %v490_v46  ;;  %v665_v1 = vsub.f32 %v348_v63, %v492_v61  ;;  %1140 = vperm.xlu0 %1558, %v1046_v11   ;;  %v1047_v5 = vsub.f32 0.0, %v862_v15  ;;  %v1048_v48 = vsub.f32 0.0, %v864_v16 }
  0x97   :  { %v494_v55 = vrot.slane %v350_v62, 7  ;;  %v493_v2 = vrot.slane %v349_v60, 7  ;;  %v726_v53 = vmul.f32 %v2002_v59, %v661_v6  ;;  %v867_v9 = vrot.slane %v727_v7, 1 }
  0x98   :  { %v729_v10 = vmul.f32 %v2002_v59, %v664_v0  ;;  %v180_v45 = vpop.permute.xlu1 %179  ;;  %v178_v4 = vpop.permute.xlu0 %177  ;;  %v728_v56 = vmul.f32 %v2002_v59, %v663_v8  ;;  %v730_v17 = vmul.f32 %v2002_v59, %v665_v1 }
  0x99   :  { %v495_v18 = vsel %vm461_vm0, %v493_v2, %v494_v55  ;;  %v666_v13 = vsub.f32 %v349_v60, %v493_v2  ;;  %1145 = vperm.xlu1 %1559, %v1047_v5   ;;  %v352_v14 = vmul.f32 %v180_v45, %v1716_v19  ;;  %v351_v3 = vmul.f32 %v178_v4, %v1721_v20 }
  0x9a   :  { %v871_v63 = vrot.slane %v729_v10, 1  ;;  %1150 = vperm.xlu0 %1558, %v1048_v48   ;;  %v865_v6 = vrot.slane %v726_v53, 1  ;;  %v869_v51 = vrot.slane %v728_v56, 1  ;;  %v873_v50 = vrot.slane %v730_v17, 1 }
  0x9b   :  { %v731_v57 = vmul.f32 %v2002_v59, %v666_v13  ;;  %v498_v44 = vrot.slane %v352_v14, 7  ;;  %v496_v58 = vrot.slane %v351_v3, 7  ;;  %v667_v8 = vsub.f32 %v350_v62, %v495_v18 }
  0x9c   :  { %v866_v54 = vsel %vm843_vm1, %v863_v49, %v865_v6  ;;  %v868_v52 = vsel %vm843_vm1, %v865_v6, %v867_v9  ;;  %v184_v7 = vpop.permute.xlu1 %183  ;;  %v182_v11 = vpop.permute.xlu0 %181  ;;  %v870_v19 = vsel %vm843_vm1, %v867_v9, %v869_v51  ;;  %v872_v15 = vsel %vm843_vm1, %v869_v51, %v871_v63 }
  0x9d   :  { %v497_v20 = vsel %vm461_vm0, %v494_v55, %v496_v58  ;;  %v499_v47 = vsel %vm461_vm0, %v496_v58, %v498_v44  ;;  %v1049_v12 = vsub.f32 0.0, %v866_v54  ;;  %v1050_v61 = vsub.f32 0.0, %v868_v52 }
  0x9e   :  { %v668_v16 = vsub.f32 %v351_v3, %v497_v20  ;;  %v669_v46 = vsub.f32 %v352_v14, %v499_v47  ;;  %v2084_v62 = vmul.f32 %v184_v7, %v1730_v21  ;;  %v875_v49 = vrot.slane %v731_v57, 1 }
  0x9f   :  { %1155 = vperm.xlu1 %1559, %v1049_v12   ;;  %v353_v60 = vmul.f32 %v182_v11, %v1735_v22  ;;  %v1051_v0 = vsub.f32 0.0, %v870_v19  ;;  %v874_v1 = vsel %vm843_vm1, %v871_v63, %v873_v50  ;;  %1160 = vperm.xlu0 %1558, %v1050_v61   ;;  %v1052_v2 = vsub.f32 0.0, %v872_v15 }
  0xa0   :  { %v733_v5 = vmul.f32 %v2002_v59, %v668_v16  ;;  %v502_v55 = vrot.slane %v2084_v62, 7  ;;  %v188_v48 = vpop.permute.xlu1 %187  ;;  %v186_v53 = vpop.permute.xlu0 %185  ;;  %v1032_v9 = vsel %vm843_vm1, %v873_v50, %v730_v17  ;;  %v1053_v4 = vsub.f32 0.0, %v874_v1 }
  0xa1   :  { %v500_v10 = vrot.slane %v353_v60, 7  ;;  %v356_v21 = vmul.f32 %v188_v48, %v1744_v23  ;;  %v355_v45 = vmul.f32 %v186_v53, %v1749_v24  ;;  %v1054_v56 = vsub.f32 0.0, %v1032_v9 }
  0xa2   :  { %v878_v22 = vrot.slane %v733_v5, 1  ;;  %v732_v18 = vmul.f32 %v2002_v59, %v667_v8  ;;  %v734_v13 = vmul.f32 %v2002_v59, %v669_v46 }
  0xa3   :  { %v501_v14 = vsel %vm461_vm0, %v498_v44, %v500_v10  ;;  %v503_v3 = vsel %vm461_vm0, %v500_v10, %v502_v55  ;;  %1165 = vperm.xlu1 %1559, %v1051_v0   ;;  %v506_v63 = vrot.slane %v356_v21, 7  ;;  %v504_v6 = vrot.slane %v355_v45, 7  ;;  %1170 = vperm.xlu0 %1558, %v1052_v2  }
  0xa4   :  { %v670_v17 = vsub.f32 %v353_v60, %v501_v14  ;;  %v671_v51 = vsub.f32 %v2084_v62, %v503_v3  ;;  %v192_v23 = vpop.permute.xlu1 %191  ;;  %v190_v24 = vpop.permute.xlu0 %189  ;;  %v876_v57 = vrot.slane %v732_v18, 1  ;;  %v880_v58 = vrot.slane %v734_v13, 1 }
  0xa5   :  { %v505_v50 = vsel %vm461_vm0, %v502_v55, %v504_v6  ;;  %v507_v8 = vsel %vm461_vm0, %v504_v6, %v506_v63  ;;  %v358_v54 = vmul.f32 %v192_v23, %v1758_v25  ;;  %v357_v44 = vmul.f32 %v190_v24, %v1763_v26 }
  0xa6   :  { %v735_v52 = vmul.f32 %v2002_v59, %v670_v17  ;;  %v672_v7 = vsub.f32 %v355_v45, %v505_v50  ;;  %v673_v11 = vsub.f32 %v356_v21, %v507_v8  ;;  %v877_v19 = vsel %vm843_vm1, %v875_v49, %v876_v57 }
  0xa7   :  { %1175 = vperm.xlu1 %1559, %v1053_v4   ;;  %v510_v20 = vrot.slane %v358_v54, 7  ;;  %v508_v47 = vrot.slane %v357_v44, 7  ;;  %v1055_v12 = vsub.f32 0.0, %v877_v19  ;;  %v879_v15 = vsel %vm843_vm1, %v876_v57, %v878_v22  ;;  %1180 = vperm.xlu0 %1558, %v1054_v56  }
  0xa8   :  { %v882_v16 = vrot.slane %v735_v52, 1  ;;  %v737_v46 = vmul.f32 %v2002_v59, %v672_v7  ;;  %v1056_v61 = vsub.f32 0.0, %v879_v15  ;;  %v196_v25 = vpop.permute.xlu1 %195  ;;  %v194_v62 = vpop.permute.xlu0 %193  ;;  %v881_v26 = vsel %vm843_vm1, %v878_v22, %v880_v58 }
  0xa9   :  { %v509_v60 = vsel %vm461_vm0, %v506_v63, %v508_v47  ;;  %v511_v0 = vsel %vm461_vm0, %v508_v47, %v510_v20  ;;  %v360_v49 = vmul.f32 %v196_v25, %v1772_v27  ;;  %v359_v1 = vmul.f32 %v194_v62, %v1777_v28 }
  0xaa   :  { %v886_v5 = vrot.slane %v737_v46, 1  ;;  %v674_v55 = vsub.f32 %v357_v44, %v509_v60  ;;  %v675_v2 = vsub.f32 %v358_v54, %v511_v0  ;;  %v1057_v48 = vsub.f32 0.0, %v881_v26 }
  0xab   :  { %1185 = vperm.xlu1 %1559, %v1055_v12   ;;  %v514_v53 = vrot.slane %v360_v49, 7  ;;  %v512_v9 = vrot.slane %v359_v1, 7  ;;  %v883_v10 = vsel %vm843_vm1, %v880_v58, %v882_v16  ;;  %v736_v21 = vmul.f32 %v2002_v59, %v671_v51  ;;  %1190 = vperm.xlu0 %1558, %v1056_v61  }
  0xac   :  { %v739_v45 = vmul.f32 %v2002_v59, %v674_v55  ;;  %v1058_v4 = vsub.f32 0.0, %v883_v10  ;;  %v200_v22 = vpop.permute.xlu1 %199  ;;  %v198_v56 = vpop.permute.xlu0 %197  ;;  %v738_v27 = vmul.f32 %v2002_v59, %v673_v11  ;;  %v740_v28 = vmul.f32 %v2002_v59, %v675_v2 }
  0xad   :  { %v513_v18 = vsel %vm461_vm0, %v510_v20, %v512_v9  ;;  %v515_v13 = vsel %vm461_vm0, %v512_v9, %v514_v53  ;;  %v362_v14 = vmul.f32 %v200_v22, %v1786_v29  ;;  %v361_v3 = vmul.f32 %v198_v56, %v1791_v30 }
  0xae   :  { %v890_v63 = vrot.slane %v739_v45, 1  ;;  %v676_v6 = vsub.f32 %v359_v1, %v513_v18  ;;  %v677_v17 = vsub.f32 %v360_v49, %v515_v13  ;;  %v884_v51 = vrot.slane %v736_v21, 1 }
  0xaf   :  { %1195 = vperm.xlu1 %1559, %v1057_v48   ;;  %v518_v23 = vrot.slane %v362_v14, 7  ;;  %v516_v24 = vrot.slane %v361_v3, 7  ;;  %v888_v57 = vrot.slane %v738_v27, 1  ;;  %v892_v58 = vrot.slane %v740_v28, 1  ;;  %1200 = vperm.xlu0 %1558, %v1058_v4  }
  0xb0   :  { %v741_v50 = vmul.f32 %v2002_v59, %v676_v6  ;;  %v885_v8 = vsel %vm843_vm1, %v882_v16, %v884_v51  ;;  %v887_v54 = vsel %vm843_vm1, %v884_v51, %v886_v5  ;;  %v204_v44 = vpop.permute.xlu1 %203  ;;  %v202_v29 = vpop.permute.xlu0 %201  ;;  %v742_v12 = vmul.f32 %v2002_v59, %v677_v17 }
  0xb1   :  { %v517_v30 = vsel %vm461_vm0, %v514_v53, %v516_v24  ;;  %v519_v52 = vsel %vm461_vm0, %v516_v24, %v518_v23  ;;  %v1059_v7 = vsub.f32 0.0, %v885_v8  ;;  %v1060_v11 = vsub.f32 0.0, %v887_v54 }
  0xb2   :  { %v894_v19 = vrot.slane %v741_v50, 1  ;;  %v678_v20 = vsub.f32 %v361_v3, %v517_v30  ;;  %v364_v47 = vmul.f32 %v204_v44, %v1800_v31  ;;  %v363_v15 = vmul.f32 %v202_v29, %v1805_v32 }
  0xb3   :  { %1205 = vperm.xlu1 %1559, %v1059_v7   ;;  %v889_v16 = vsel %vm843_vm1, %v886_v5, %v888_v57  ;;  %v891_v46 = vsel %vm843_vm1, %v888_v57, %v890_v63  ;;  %v893_v61 = vsel %vm843_vm1, %v890_v63, %v892_v58  ;;  %v679_v25 = vsub.f32 %v362_v14, %v519_v52 }
  0xb4   :  { %v743_v62 = vmul.f32 %v2002_v59, %v678_v20  ;;  %1210 = vperm.xlu0 %1558, %v1060_v11   ;;  %v522_v26 = vrot.slane %v364_v47, 7  ;;  %v1062_v60 = vsub.f32 0.0, %v891_v46  ;;  %v208_v0 = vpop.permute.xlu1 %207  ;;  %v206_v49 = vpop.permute.xlu0 %205  ;;  %v520_v31 = vrot.slane %v363_v15, 7 }
  0xb5   :  { %v1061_v1 = vsub.f32 0.0, %v889_v16  ;;  %v2133_v55 = vmul.f32 %v208_v0, %v1814_v33  ;;  %v365_v32 = vmul.f32 %v206_v49, %v1819_v34  ;;  %v1063_v2 = vsub.f32 0.0, %v893_v61 }
  0xb6   :  { %v898_v5 = vrot.slane %v743_v62, 1  ;;  %v895_v48 = vsel %vm843_vm1, %v892_v58, %v894_v19  ;;  %v896_v53 = vrot.slane %v742_v12, 1  ;;  %v521_v9 = vsel %vm461_vm0, %v518_v23, %v520_v31 }
  0xb7   :  { %v523_v10 = vsel %vm461_vm0, %v520_v31, %v522_v26  ;;  %1215 = vperm.xlu1 %1559, %v1061_v1   ;;  %v525_v21 = vrot.slane %v2133_v55, 7  ;;  %v524_v45 = vrot.slane %v365_v32, 7  ;;  %v680_v4 = vsub.f32 %v363_v15, %v521_v9 }
  0xb8   :  { %v681_v22 = vsub.f32 %v364_v47, %v523_v10  ;;  %1220 = vperm.xlu0 %1558, %v1062_v60   ;;  %v1064_v33 = vsub.f32 0.0, %v895_v48  ;;  %v212_v56 = vpop.permute.xlu1 %211  ;;  %v210_v27 = vpop.permute.xlu0 %209  ;;  %v744_v34 = vmul.f32 %v2002_v59, %v679_v25  ;;  %v897_v14 = vsel %vm843_vm1, %v894_v19, %v896_v53 }
  0xb9   :  { %v526_v28 = vsel %vm461_vm0, %v524_v45, %v525_v21  ;;  %v368_v18 = vmul.f32 %v212_v56, %v1828_v35  ;;  %v367_v13 = vmul.f32 %v210_v27, %v1833_v36  ;;  %v745_v3 = vmul.f32 %v2002_v59, %v680_v4 }
  0xba   :  { %v746_v63 = vmul.f32 %v2002_v59, %v681_v22  ;;  %v682_v6 = vsub.f32 %v365_v32, %v524_v45  ;;  %v683_v17 = vsub.f32 %v2133_v55, %v526_v28  ;;  %v899_v24 = vsel %vm843_vm1, %v896_v53, %v898_v5 }
  0xbb   :  { %1225 = vperm.xlu1 %1559, %v1063_v2   ;;  %v529_v51 = vrot.slane %v368_v18, 7  ;;  %v527_v23 = vrot.slane %v367_v13, 7  ;;  %v902_v57 = vrot.slane %v745_v3, 1  ;;  %v1065_v58 = vsub.f32 0.0, %v897_v14 }
  0xbc   :  { %1230 = vperm.xlu0 %1558, %v1064_v33   ;;  %v1066_v35 = vsub.f32 0.0, %v899_v24  ;;  %v216_v50 = vpop.permute.xlu1 %215  ;;  %v214_v36 = vpop.permute.xlu0 %213  ;;  %v900_v8 = vrot.slane %v744_v34, 1  ;;  %v904_v30 = vrot.slane %v746_v63, 1  ;;  %v747_v20 = vmul.f32 %v2002_v59, %v682_v6 }
  0xbd   :  { %v528_v54 = vsel %vm461_vm0, %v525_v21, %v527_v23  ;;  %v530_v44 = vsel %vm461_vm0, %v527_v23, %v529_v51  ;;  %v370_v29 = vmul.f32 %v216_v50, %v1842_v37  ;;  %v369_v11 = vmul.f32 %v214_v36, %v1847_v38 }
  0xbe   :  { %v684_v52 = vsub.f32 %v367_v13, %v528_v54  ;;  %v685_v7 = vsub.f32 %v368_v18, %v530_v44  ;;  %v901_v19 = vsel %vm843_vm1, %v898_v5, %v900_v8  ;;  %v903_v15 = vsel %vm843_vm1, %v900_v8, %v902_v57 }
  0xbf   :  { %1235 = vperm.xlu1 %1559, %v1065_v58   ;;  %v533_v47 = vrot.slane %v370_v29, 7  ;;  %v1067_v12 = vsub.f32 0.0, %v901_v19  ;;  %v531_v37 = vrot.slane %v369_v11, 7  ;;  %v1068_v61 = vsub.f32 0.0, %v903_v15 }
  0xc0   :  { %v749_v16 = vmul.f32 %v2002_v59, %v684_v52  ;;  %v750_v46 = vmul.f32 %v2002_v59, %v685_v7  ;;  %1240 = vperm.xlu0 %1558, %v1066_v35   ;;  %v220_v25 = vpop.permute.xlu1 %219  ;;  %v218_v62 = vpop.permute.xlu0 %217  ;;  %v905_v60 = vsel %vm843_vm1, %v902_v57, %v904_v30  ;;  %v1033_v0 = vsel %vm843_vm1, %v904_v30, %v746_v63  ;;  %v2706_v57 = vld [vmem:[#allocation3_spill] sm:$0xff] }
  0xc1   :  { %v372_v38 = vmul.f32 %v220_v25, %v1856_v39  ;;  %v371_v26 = vmul.f32 %v218_v62, %v1861_v40  ;;  %v532_v1 = vsel %vm461_vm0, %v529_v51, %v531_v37  ;;  %v534_v55 = vsel %vm461_vm0, %v531_v37, %v533_v47  ;;  %v2708_v25 = vld [vmem:[#allocation5_spill] sm:$0xff] }
  0xc2   :  { %v909_v49 = vrot.slane %v749_v16, 1  ;;  %v911_v31 = vrot.slane %v750_v46, 1  ;;  %v686_v32 = vsub.f32 %v369_v11, %v532_v1  ;;  %v687_v5 = vsub.f32 %v370_v29, %v534_v55  ;;  %v2707_v16 = vld [vmem:[#allocation4_spill] sm:$0xff] }
  0xc3   :  { %1245 = vperm.xlu1 %1559, %v1067_v12   ;;  %v537_v2 = vrot.slane %v372_v38, 7  ;;  %v535_v48 = vrot.slane %v371_v26, 7  ;;  %v906_v53 = vrot.slane %v747_v20, 1  ;;  %v1069_v39 = vsub.f32 0.0, %v905_v60 }
  0xc4   :  { %1250 = vperm.xlu0 %1558, %v1068_v61   ;;  %v1070_v9 = vsub.f32 0.0, %v1033_v0  ;;  %v224_v40 = vpop.permute.xlu1 %223  ;;  %v222_v10 = vpop.permute.xlu0 %221  ;;  %v748_v21 = vmul.f32 %v2002_v59, %v683_v17  ;;  %v751_v45 = vmul.f32 %v2002_v59, %v686_v32  ;;  %v752_v4 = vmul.f32 %v2002_v59, %v687_v5 }
  0xc5   :  { %v536_v22 = vsel %vm461_vm0, %v533_v47, %v535_v48  ;;  %v538_v33 = vsel %vm461_vm0, %v535_v48, %v537_v2  ;;  %v374_v34 = vmul.f32 %v224_v40, %v1870_v41  ;;  %v373_v28 = vmul.f32 %v222_v10, %v1875_v42 }
  0xc6   :  { %v688_v56 = vsub.f32 %v371_v26, %v536_v22  ;;  %v689_v27 = vsub.f32 %v372_v38, %v538_v33  ;;  %v913_v18 = vrot.slane %v751_v45, 1  ;;  %v907_v13 = vrot.slane %v748_v21, 1  ;;  %v2710_v45 = vld [vmem:[#allocation7_spill] sm:$0xff] }
  0xc7   :  { %1255 = vperm.xlu1 %1559, %v1069_v39   ;;  %v912_v14 = vsel %vm843_vm1, %v909_v49, %v911_v31  ;;  %v541_v6 = vrot.slane %v374_v34, 7  ;;  %v539_v17 = vrot.slane %v373_v28, 7  ;;  %v915_v35 = vrot.slane %v752_v4, 1 }
  0xc8   :  { %v753_v3 = vmul.f32 %v2002_v59, %v688_v56  ;;  %v754_v63 = vmul.f32 %v2002_v59, %v689_v27  ;;  %1260 = vperm.xlu0 %1558, %v1070_v9   ;;  %v228_v51 = vpop.permute.xlu1 %227  ;;  %v226_v23 = vpop.permute.xlu0 %225  ;;  %v908_v24 = vsel %vm843_vm1, %v906_v53, %v907_v13  ;;  %v910_v41 = vsel %vm843_vm1, %v907_v13, %v909_v49  ;;  %v2709_v9 = vld [vmem:[#allocation6_spill] sm:$0xff] }
  0xc9   :  { %v376_v42 = vmul.f32 %v228_v51, %v1884_v43  ;;  %v375_v58 = vmul.f32 %v226_v23, %v2706_v57  ;;  %v540_v36 = vsel %vm461_vm0, %v537_v2, %v539_v17  ;;  %v542_v8 = vsel %vm461_vm0, %v539_v17, %v541_v6  ;;  %v2711_v23 = vld [vmem:[#allocation8_spill] sm:$0xff] }
  0xca   :  { %v917_v50 = vrot.slane %v753_v3, 1  ;;  %v690_v54 = vsub.f32 %v373_v28, %v540_v36  ;;  %v691_v44 = vsub.f32 %v374_v34, %v542_v8  ;;  %v1071_v29 = vsub.f32 0.0, %v908_v24 }
  0xcb   :  { %v1072_v30 = vsub.f32 0.0, %v910_v41  ;;  %v919_v52 = vrot.slane %v754_v63, 1  ;;  %v545_v7 = vrot.slane %v376_v42, 7  ;;  %v543_v11 = vrot.slane %v375_v58, 7 }
  0xcc   :  { %v914_v19 = vsel %vm843_vm1, %v911_v31, %v913_v18  ;;  %v232_v20 = vpop.permute.xlu1 %231  ;;  %v230_v47 = vpop.permute.xlu0 %229  ;;  %v755_v43 = vmul.f32 %v2002_v59, %v690_v54  ;;  %v756_v12 = vmul.f32 %v2002_v59, %v691_v44  ;;  %1265 = vperm.xlu1 %1559, %v1071_v29   ;;  %v916_v38 = vsel %vm843_vm1, %v913_v18, %v915_v35 }
  0xcd   :  { %1270 = vperm.xlu0 %1558, %v1072_v30   ;;  %v1074_v15 = vsub.f32 0.0, %v914_v19  ;;  %v378_v46 = vmul.f32 %v232_v20, %v2707_v16  ;;  %v544_v37 = vsel %vm461_vm0, %v541_v6, %v543_v11  ;;  %v546_v61 = vsel %vm461_vm0, %v543_v11, %v545_v7 }
  0xce   :  { %v377_v62 = vmul.f32 %v230_v47, %v2708_v25  ;;  %v921_v26 = vrot.slane %v755_v43, 1  ;;  %v692_v60 = vsub.f32 %v375_v58, %v544_v37  ;;  %v693_v0 = vsub.f32 %v376_v42, %v546_v61  ;;  %v2712_v58 = vld [vmem:[#allocation9_spill] sm:$0xff]  ;;  %v2713_v43 = vld [vmem:[#allocation10_spill] sm:$0xff]  ;;  %v2714_v37 = vld [vmem:[#allocation11_spill] sm:$0xff] }
  0xcf   :  { %v1073_v49 = vsub.f32 0.0, %v912_v14  ;;  %v923_v31 = vrot.slane %v756_v12, 1  ;;  %v549_v1 = vrot.slane %v378_v46, 7  ;;  %v918_v32 = vsel %vm843_vm1, %v915_v35, %v917_v50 }
  0xd0   :  { %v547_v55 = vrot.slane %v377_v62, 7  ;;  %v236_v5 = vpop.permute.xlu1 %235  ;;  %v234_v2 = vpop.permute.xlu0 %233  ;;  %v757_v48 = vmul.f32 %v2002_v59, %v692_v60  ;;  %v1075_v53 = vsub.f32 0.0, %v916_v38  ;;  %v1076_v39 = vsub.f32 0.0, %v918_v32 }
  0xd1   :  { %1275 = vperm.xlu1 %1559, %v1073_v49   ;;  %1280 = vperm.xlu0 %1558, %v1074_v15   ;;  %v380_v40 = vmul.f32 %v236_v5, %v2709_v9  ;;  %v379_v4 = vmul.f32 %v234_v2, %v2710_v45  ;;  %v920_v22 = vsel %vm843_vm1, %v917_v50, %v919_v52  ;;  %v2715_v2 = vld [vmem:[#allocation12_spill] sm:$0xff] }
  0xd2   :  { %v548_v10 = vsel %vm461_vm0, %v545_v7, %v547_v55  ;;  %v550_v21 = vsel %vm461_vm0, %v547_v55, %v549_v1  ;;  %v758_v33 = vmul.f32 %v2002_v59, %v693_v0  ;;  %v925_v56 = vrot.slane %v757_v48, 1 }
  0xd3   :  { %v694_v27 = vsub.f32 %v377_v62, %v548_v10  ;;  %v695_v34 = vsub.f32 %v378_v46, %v550_v21  ;;  %v553_v28 = vrot.slane %v380_v40, 7  ;;  %v551_v18 = vrot.slane %v379_v4, 7 }
  0xd4   :  { %v922_v13 = vsel %vm843_vm1, %v919_v52, %v921_v26  ;;  %v240_v14 = vpop.permute.xlu1 %239  ;;  %v238_v3 = vpop.permute.xlu0 %237  ;;  %v924_v63 = vsel %vm843_vm1, %v921_v26, %v923_v31  ;;  %v1077_v17 = vsub.f32 0.0, %v920_v22  ;;  %v927_v50 = vrot.slane %v758_v33, 1 }
  0xd5   :  { %v759_v6 = vmul.f32 %v2002_v59, %v694_v27  ;;  %1285 = vperm.xlu1 %1559, %v1075_v53   ;;  %1290 = vperm.xlu0 %1558, %v1076_v39   ;;  %v1078_v51 = vsub.f32 0.0, %v922_v13  ;;  %v382_v24 = vmul.f32 %v240_v14, %v2711_v23  ;;  %v760_v41 = vmul.f32 %v2002_v59, %v695_v34  ;;  %v2716_v53 = vld [vmem:[#allocation13_spill] sm:$0xff] }
  0xd6   :  { %v552_v42 = vsel %vm461_vm0, %v549_v1, %v551_v18  ;;  %v554_v57 = vsel %vm461_vm0, %v551_v18, %v553_v28  ;;  %v381_v35 = vmul.f32 %v238_v3, %v2712_v58  ;;  %v1079_v54 = vsub.f32 0.0, %v924_v63 }
  0xd7   :  { %v696_v36 = vsub.f32 %v379_v4, %v552_v42  ;;  %v697_v8 = vsub.f32 %v380_v40, %v554_v57  ;;  %v929_v44 = vrot.slane %v759_v6, 1  ;;  %v556_v29 = vrot.slane %v382_v24, 7  ;;  %v1560_v6 = vld [vmem:[%s2681_s1 + $0x1b8] sm:$0xff] }
  0xd8   :  { %v555_v30 = vrot.slane %v381_v35, 7  ;;  %v926_v52 = vsel %vm843_vm1, %v923_v31, %v925_v56  ;;  %v244_v7 = vpop.permute.xlu1 %243  ;;  %v242_v11 = vpop.permute.xlu0 %241  ;;  %v931_v15 = vrot.slane %v760_v41, 1  ;;  %v928_v26 = vsel %vm843_vm1, %v925_v56, %v927_v50  ;;  %v1561_v41 = vld [vmem:[%s2681_s1 + $0x1b0] sm:$0xff] }
  0xd9   :  { %v761_v19 = vmul.f32 %v2002_v59, %v696_v36  ;;  %v762_v20 = vmul.f32 %v2002_v59, %v697_v8  ;;  %1295 = vperm.xlu1 %1559, %v1077_v17   ;;  %1300 = vperm.xlu0 %1558, %v1078_v51   ;;  %v1080_v47 = vsub.f32 0.0, %v926_v52  ;;  %v384_v12 = vmul.f32 %v244_v7, %v2713_v43 }
  0xda   :  { %v557_v16 = vsel %vm461_vm0, %v555_v30, %v556_v29  ;;  %v698_v46 = vsub.f32 %v381_v35, %v555_v30  ;;  %v383_v61 = vmul.f32 %v242_v11, %v2714_v37  ;;  %v930_v31 = vsel %vm843_vm1, %v927_v50, %v929_v44 }
  0xdb   :  { %v933_v25 = vrot.slane %v761_v19, 1  ;;  %v699_v62 = vsub.f32 %v382_v24, %v557_v16  ;;  %v560_v38 = vrot.slane %v384_v12, 7  ;;  %v935_v60 = vrot.slane %v762_v20, 1  ;;  %v1562_v19 = vld [vmem:[%s2681_s1 + $0x1c8] sm:$0xff] }
  0xdc   :  { %v763_v0 = vmul.f32 %v2002_v59, %v698_v46  ;;  %v558_v49 = vrot.slane %v383_v61, 7  ;;  %v248_v1 = vpop.permute.xlu1 %247  ;;  %v246_v55 = vpop.permute.xlu0 %245  ;;  %v1082_v5 = vsub.f32 0.0, %v930_v31  ;;  %v1081_v10 = vsub.f32 0.0, %v928_v26 }
  0xdd   :  { %v764_v32 = vmul.f32 %v2002_v59, %v699_v62  ;;  %1305 = vperm.xlu1 %1559, %v1079_v54   ;;  %1310 = vperm.xlu0 %1558, %v1080_v47   ;;  %v386_v48 = vmul.f32 %v248_v1, %v2715_v2  ;;  %v385_v39 = vmul.f32 %v246_v55, %v2716_v53  ;;  %v1564_v55 = vld [vmem:[%s2681_s1 + $0x1d8] sm:$0xff]  ;;  %v1565_v53 = vld [vmem:[%s2681_s1 + $0x1d0] sm:$0xff] }
  0xde   :  { %v559_v9 = vsel %vm461_vm0, %v556_v29, %v558_v49  ;;  %v561_v40 = vsel %vm461_vm0, %v558_v49, %v560_v38  ;;  %v932_v21 = vsel %vm843_vm1, %v929_v44, %v931_v15  ;;  %v937_v45 = vrot.slane %v763_v0, 1 }
  0xdf   :  { %v700_v4 = vsub.f32 %v383_v61, %v559_v9  ;;  %v701_v22 = vsub.f32 %v384_v12, %v561_v40  ;;  %v564_v33 = vrot.slane %v386_v48, 7  ;;  %v938_v56 = vrot.slane %v764_v32, 1  ;;  %v1563_v12 = vld [vmem:[%s2681_s1 + $0x1c0] sm:$0xff] }
  0xe0   :  { %v562_v27 = vrot.slane %v385_v39, 7  ;;  %v934_v34 = vsel %vm843_vm1, %v931_v15, %v933_v25  ;;  %v252_v28 = vpop.permute.xlu1 %251  ;;  %v250_v18 = vpop.permute.xlu0 %249  ;;  %v936_v13 = vsel %vm843_vm1, %v933_v25, %v935_v60  ;;  %v1083_v24 = vsub.f32 0.0, %v932_v21 }
  0xe1   :  { %v765_v14 = vmul.f32 %v2002_v59, %v700_v4  ;;  %v766_v3 = vmul.f32 %v2002_v59, %v701_v22  ;;  %1315 = vperm.xlu1 %1559, %v1081_v10   ;;  %1320 = vperm.xlu0 %1558, %v1082_v5   ;;  %v1084_v63 = vsub.f32 0.0, %v934_v34  ;;  %v388_v17 = vmul.f32 %v1560_v6, %v252_v28  ;;  %v1567_v6 = vld [vmem:[%s2681_s1 + $0x1e0] sm:$0xff] }
  0xe2   :  { %v563_v51 = vsel %vm461_vm0, %v560_v38, %v562_v27  ;;  %v565_v23 = vsel %vm461_vm0, %v562_v27, %v564_v33  ;;  %v387_v42 = vmul.f32 %v1561_v41, %v250_v18  ;;  %v1034_v50 = vsel %vm843_vm1, %v935_v60, %v762_v20  ;;  %v1566_v18 = vld [vmem:[%s2681_s1 + $0x1e8] sm:$0xff] }
  0xe3   :  { %v940_v57 = vrot.slane %v765_v14, 1  ;;  %v702_v58 = vsub.f32 %v385_v39, %v563_v51  ;;  %v703_v35 = vsub.f32 %v386_v48, %v565_v23  ;;  %v568_v36 = vrot.slane %v388_v17, 7 }
  0xe4   :  { %v566_v8 = vrot.slane %v387_v42, 7  ;;  %v1085_v54 = vsub.f32 0.0, %v936_v13  ;;  %v256_v44 = vpop.permute.xlu1 %255  ;;  %v254_v29 = vpop.permute.xlu0 %253  ;;  %v939_v30 = vsel %vm843_vm1, %v937_v45, %v938_v56  ;;  %v942_v52 = vrot.slane %v766_v3, 1 }
  0xe5   :  { %v767_v7 = vmul.f32 %v2002_v59, %v702_v58  ;;  %v768_v11 = vmul.f32 %v2002_v59, %v703_v35  ;;  %1325 = vperm.xlu1 %1559, %v1083_v24   ;;  %1330 = vperm.xlu0 %1558, %v1084_v63   ;;  %v390_v47 = vmul.f32 %v1562_v19, %v256_v44  ;;  %v1086_v25 = vsub.f32 0.0, %v1034_v50  ;;  %v1568_v44 = vld [vmem:[%s2681_s1 + $0x1f8] sm:$0xff] }
  0xe6   :  { %v567_v20 = vsel %vm461_vm0, %v564_v33, %v566_v8  ;;  %v569_v43 = vsel %vm461_vm0, %v566_v8, %v568_v36  ;;  %v389_v15 = vmul.f32 %v1563_v12, %v254_v29  ;;  %v941_v16 = vsel %vm843_vm1, %v938_v56, %v940_v57 }
  0xe7   :  { %v944_v46 = vrot.slane %v767_v7, 1  ;;  %v704_v37 = vsub.f32 %v387_v42, %v567_v20  ;;  %v705_v61 = vsub.f32 %v388_v17, %v569_v43  ;;  %v946_v62 = vrot.slane %v768_v11, 1  ;;  %v1569_v11 = vld [vmem:[%s2681_s1 + $0x1f0] sm:$0xff] }
  0xe8   :  { %v572_v38 = vrot.slane %v390_v47, 7  ;;  %v570_v26 = vrot.slane %v389_v15, 7  ;;  %v1087_v60 = vsub.f32 0.0, %v939_v30  ;;  %v260_v0 = vpop.permute.xlu1 %259  ;;  %v258_v49 = vpop.permute.xlu0 %257  ;;  %v1088_v1 = vsub.f32 0.0, %v941_v16 }
  0xe9   :  { %v769_v31 = vmul.f32 %v2002_v59, %v704_v37  ;;  %1335 = vperm.xlu1 %1559, %v1085_v54   ;;  %1340 = vperm.xlu0 %1558, %v1086_v25   ;;  %v392_v32 = vmul.f32 %v1564_v55, %v260_v0  ;;  %v943_v5 = vsel %vm843_vm1, %v940_v57, %v942_v52 }
  0xea   :  { %v571_v2 = vsel %vm461_vm0, %v568_v36, %v570_v26  ;;  %v573_v48 = vsel %vm461_vm0, %v570_v26, %v572_v38  ;;  %v391_v39 = vmul.f32 %v1565_v53, %v258_v49  ;;  %v945_v9 = vsel %vm843_vm1, %v942_v52, %v944_v46 }
  0xeb   :  { %v770_v40 = vmul.f32 %v2002_v59, %v705_v61  ;;  %v948_v10 = vrot.slane %v769_v31, 1  ;;  %v706_v21 = vsub.f32 %v389_v15, %v571_v2  ;;  %v707_v45 = vsub.f32 %v390_v47, %v573_v48 }
  0xec   :  { %v576_v4 = vrot.slane %v392_v32, 7  ;;  %v574_v22 = vrot.slane %v391_v39, 7  ;;  %v1089_v33 = vsub.f32 0.0, %v943_v5  ;;  %v264_v56 = vpop.permute.xlu1 %263  ;;  %v262_v27 = vpop.permute.xlu0 %261  ;;  %v1090_v28 = vsub.f32 0.0, %v945_v9 }
  0xed   :  { %v771_v34 = vmul.f32 %v2002_v59, %v706_v21  ;;  %1345 = vperm.xlu1 %1559, %v1087_v60   ;;  %1350 = vperm.xlu0 %1558, %v1088_v1   ;;  %v394_v13 = vmul.f32 %v1566_v18, %v264_v56  ;;  %v947_v14 = vsel %vm843_vm1, %v944_v46, %v946_v62  ;;  %v950_v23 = vrot.slane %v770_v40, 1 }
  0xee   :  { %v575_v3 = vsel %vm461_vm0, %v572_v38, %v574_v22  ;;  %v577_v63 = vsel %vm461_vm0, %v574_v22, %v576_v4  ;;  %v393_v17 = vmul.f32 %v1567_v6, %v262_v27  ;;  %v949_v51 = vsel %vm843_vm1, %v946_v62, %v948_v10 }
  0xef   :  { %v772_v24 = vmul.f32 %v2002_v59, %v707_v45  ;;  %v952_v41 = vrot.slane %v771_v34, 1  ;;  %v708_v42 = vsub.f32 %v391_v39, %v575_v3  ;;  %v709_v57 = vsub.f32 %v392_v32, %v577_v63 }
  0xf0   :  { %v580_v58 = vrot.slane %v394_v13, 7  ;;  %v578_v35 = vrot.slane %v393_v17, 7  ;;  %v268_v50 = vpop.permute.xlu1 %267  ;;  %v1091_v8 = vsub.f32 0.0, %v947_v14  ;;  %v1092_v54 = vsub.f32 0.0, %v949_v51 }
  0xf1   :  { %v773_v36 = vmul.f32 %v2002_v59, %v708_v42  ;;  %1355 = vperm.xlu1 %1559, %v1089_v33   ;;  %1360 = vperm.xlu0 %1558, %v1090_v28   ;;  %v396_v29 = vmul.f32 %v1568_v44, %v268_v50  ;;  %v266_v30 = vpop.permute.xlu0 %265  ;;  %v953_v47 = vsel %vm843_vm1, %v950_v23, %v952_v41  ;;  %v954_v20 = vrot.slane %v772_v24, 1 }
  0xf2   :  { %v579_v52 = vsel %vm461_vm0, %v576_v4, %v578_v35  ;;  %v581_v7 = vsel %vm461_vm0, %v578_v35, %v580_v58  ;;  %v395_v19 = vmul.f32 %v1569_v11, %v266_v30  ;;  %v951_v15 = vsel %vm843_vm1, %v948_v10, %v950_v23 }
  0xf3   :  { %v956_v43 = vrot.slane %v773_v36, 1  ;;  %v710_v12 = vsub.f32 %v393_v17, %v579_v52  ;;  %v774_v16 = vmul.f32 %v2002_v59, %v709_v57  ;;  %v711_v46 = vsub.f32 %v394_v13, %v581_v7 }
  0xf4   :  { %v584_v37 = vrot.slane %v396_v29, 7  ;;  %v582_v61 = vrot.slane %v395_v19, 7  ;;  %v1094_v62 = vsub.f32 0.0, %v953_v47  ;;  %v1093_v31 = vsub.f32 0.0, %v951_v15 }
  0xf5   :  { %v775_v25 = vmul.f32 %v2002_v59, %v710_v12  ;;  %1365 = vperm.xlu1 %1559, %v1091_v8   ;;  %1370 = vperm.xlu0 %1558, %v1092_v54   ;;  %v957_v60 = vsel %vm843_vm1, %v954_v20, %v956_v43  ;;  %v958_v1 = vrot.slane %v774_v16, 1  ;;  %v776_v55 = vmul.f32 %v2002_v59, %v711_v46 }
  0xf6   :  { %v583_v38 = vsel %vm461_vm0, %v580_v58, %v582_v61  ;;  %v585_v26 = vsel %vm461_vm0, %v582_v61, %v584_v37  ;;  %v955_v5 = vsel %vm843_vm1, %v952_v41, %v954_v20  ;;  %v1096_v48 = vsub.f32 0.0, %v957_v60 }
  0xf7   :  { %v960_v0 = vrot.slane %v775_v25, 1  ;;  %v712_v49 = vsub.f32 %v395_v19, %v583_v38  ;;  %v713_v32 = vsub.f32 %v396_v29, %v585_v26  ;;  %v1036_v53 = vlaneseq }
  0xf8   :  { %v1095_v40 = vsub.f32 0.0, %v955_v5  ;;  %v962_v10 = vrot.slane %v776_v55, 1  ;;  %v959_v45 = vsel %vm843_vm1, %v956_v43, %v958_v1 }
  0xf9   :  { %v777_v2 = vmul.f32 %v2002_v59, %v712_v49  ;;  %1375 = vperm.xlu1 %1559, %v1093_v31   ;;  %1380 = vperm.xlu0 %1558, %v1094_v62   ;;  %v961_v39 = vsel %vm843_vm1, %v958_v1, %v960_v0  ;;  %v778_v21 = vmul.f32 %v2002_v59, %v713_v32  ;;  %v2290_v22 = vand.u32 127, %v1036_v53 }
  0xfa   :  { %v1098_v4 = vsub.f32 0.0, %v961_v39  ;;  %v1097_v56 = vsub.f32 0.0, %v959_v45  ;;  %v963_v34 = vsel %vm843_vm1, %v960_v0, %v962_v10 }
  0xfb   :  { %v964_v9 = vrot.slane %v777_v2, 1  ;;  %v966_v27 = vrot.slane %v778_v21, 1  ;;  %vm1038_vm2 = vcmp.eq.s32.totalorder %v2290_v22, 0  ;;  %v1099_v59 = vsub.f32 0.0, %v963_v34 }
  0xfd   :  { %1385 = vperm.xlu1 %1559, %v1095_v40   ;;  %1390 = vperm.xlu0 %1558, %v1096_v48   ;;  %v965_v33 = vsel %vm843_vm1, %v962_v10, %v964_v9  ;;  %v967_v3 = vsel %vm843_vm1, %v964_v9, %v966_v27  ;;  %v1035_v63 = vsel %vm843_vm1, %v966_v27, %v778_v21 }
  0xfe   :  { %v1100_v28 = vsub.f32 0.0, %v965_v33  ;;  %v1101_v17 = vsub.f32 0.0, %v967_v3  ;;  %v1102_v51 = vsub.f32 0.0, %v1035_v63 }
 0x101   :  { %1395 = vperm.xlu1 %1559, %v1097_v56   ;;  %1400 = vperm.xlu0 %1558, %v1098_v4  }
 0x103   :  { %v1111_v18 = vpop.permute.xlu1 %1110 }
 0x104   :  { %v1424_v13 = vsel %vm1038_vm2, %v1111_v18, 0.0  ;;  %v1106_v14 = vpop.permute.xlu0 %1105 }
 0x105   :  { %1405 = vperm.xlu1 %1559, %v1099_v59   ;;  %1410 = vperm.xlu0 %1558, %v1100_v28   ;;  %1489 = vst.msk [vmem:[%s2683_s2 + $0x8] sm:$0xff] %vm1487_vm3, %v1424_v13  ;;  %v1423_v6 = vsel %vm1038_vm2, %v1106_v14, 0.0 }
 0x106   :  { %1488 = vst.msk [vmem:[%s2683_s2] sm:$0xff] %vm1487_vm3, %v1423_v6 }
 0x107   :  { %v1116_v23 = vpop.permute.xlu1 %1115 }
 0x108   :  { %v1425_v24 = vsel %vm1038_vm2, %v1116_v23, 0.0  ;;  %v1121_v41 = vpop.permute.xlu0 %1120 }
 0x109   :  { %1415 = vperm.xlu1 %1559, %v1101_v17   ;;  %1420 = vperm.xlu0 %1558, %v1102_v51   ;;  %1490 = vst.msk [vmem:[%s2683_s2 + $0x10] sm:$0xff] %vm1487_vm3, %v1425_v24  ;;  %v1426_v42 = vsel %vm1038_vm2, %v1121_v41, 0.0 }
 0x10a   :  { %1491 = vst.msk [vmem:[%s2683_s2 + $0x18] sm:$0xff] %vm1487_vm3, %v1426_v42 }
 0x10c   :  { %v1126_v57 = vpop.permute.xlu1 %1125 }
 0x10d   :  { %v1427_v58 = vsel %vm1038_vm2, %v1126_v57, 0.0  ;;  %v1131_v35 = vpop.permute.xlu0 %1130 }
 0x10e   :  { %1492 = vst.msk [vmem:[%s2683_s2 + $0x20] sm:$0xff] %vm1487_vm3, %v1427_v58  ;;  %v1428_v50 = vsel %vm1038_vm2, %v1131_v35, 0.0 }
 0x10f   :  { %1493 = vst.msk [vmem:[%s2683_s2 + $0x28] sm:$0xff] %vm1487_vm3, %v1428_v50 }
 0x110   :  { %v1136_v36 = vpop.permute.xlu1 %1135 }
 0x111   :  { %v1429_v8 = vsel %vm1038_vm2, %v1136_v36, 0.0  ;;  %v1141_v54 = vpop.permute.xlu0 %1140 }
 0x112   :  { %1494 = vst.msk [vmem:[%s2683_s2 + $0x30] sm:$0xff] %vm1487_vm3, %v1429_v8  ;;  %v1430_v44 = vsel %vm1038_vm2, %v1141_v54, 0.0 }
 0x113   :  { %1495 = vst.msk [vmem:[%s2683_s2 + $0x38] sm:$0xff] %vm1487_vm3, %v1430_v44 }
 0x114   :  { %v1146_v29 = vpop.permute.xlu1 %1145 }
 0x115   :  { %v1431_v30 = vsel %vm1038_vm2, %v1146_v29, 0.0  ;;  %v1151_v52 = vpop.permute.xlu0 %1150 }
 0x116   :  { %1496 = vst.msk [vmem:[%s2683_s2 + $0x40] sm:$0xff] %vm1487_vm3, %v1431_v30  ;;  %v1432_v7 = vsel %vm1038_vm2, %v1151_v52, 0.0 }
 0x117   :  { %1497 = vst.msk [vmem:[%s2683_s2 + $0x48] sm:$0xff] %vm1487_vm3, %v1432_v7 }
 0x11a   :  { %v1156_v11 = vpop.permute.xlu1 %1155  ;;  %v1161_v47 = vpop.permute.xlu0 %1160 }
 0x11b   :  { %v1433_v19 = vsel %vm1038_vm2, %v1156_v11, 0.0  ;;  %v1434_v20 = vsel %vm1038_vm2, %v1161_v47, 0.0 }
 0x11c   :  { %1498 = vst.msk [vmem:[%s2683_s2 + $0x50] sm:$0xff] %vm1487_vm3, %v1433_v19  ;;  %1499 = vst.msk [vmem:[%s2683_s2 + $0x58] sm:$0xff] %vm1487_vm3, %v1434_v20 }
 0x11e   :  { %v1166_v43 = vpop.permute.xlu1 %1165  ;;  %v1171_v15 = vpop.permute.xlu0 %1170 }
 0x11f   :  { %v1435_v12 = vsel %vm1038_vm2, %v1166_v43, 0.0  ;;  %v1436_v16 = vsel %vm1038_vm2, %v1171_v15, 0.0 }
 0x120   :  { %1500 = vst.msk [vmem:[%s2683_s2 + $0x60] sm:$0xff] %vm1487_vm3, %v1435_v12  ;;  %1501 = vst.msk [vmem:[%s2683_s2 + $0x68] sm:$0xff] %vm1487_vm3, %v1436_v16 }
 0x122   :  { %v1176_v46 = vpop.permute.xlu1 %1175  ;;  %v1181_v61 = vpop.permute.xlu0 %1180 }
 0x123   :  { %v1437_v37 = vsel %vm1038_vm2, %v1176_v46, 0.0  ;;  %v1438_v25 = vsel %vm1038_vm2, %v1181_v61, 0.0 }
 0x124   :  { %1502 = vst.msk [vmem:[%s2683_s2 + $0x70] sm:$0xff] %vm1487_vm3, %v1437_v37  ;;  %1503 = vst.msk [vmem:[%s2683_s2 + $0x78] sm:$0xff] %vm1487_vm3, %v1438_v25 }
 0x126   :  { %v1186_v62 = vpop.permute.xlu1 %1185  ;;  %v1191_v26 = vpop.permute.xlu0 %1190 }
 0x127   :  { %v1439_v38 = vsel %vm1038_vm2, %v1186_v62, 0.0  ;;  %v1440_v60 = vsel %vm1038_vm2, %v1191_v26, 0.0 }
 0x128   :  { %1504 = vst.msk [vmem:[%s2683_s2 + $0x80] sm:$0xff] %vm1487_vm3, %v1439_v38  ;;  %1505 = vst.msk [vmem:[%s2683_s2 + $0x88] sm:$0xff] %vm1487_vm3, %v1440_v60 }
 0x12a   :  { %v1196_v0 = vpop.permute.xlu1 %1195  ;;  %v1201_v31 = vpop.permute.xlu0 %1200 }
 0x12b   :  { %v1441_v49 = vsel %vm1038_vm2, %v1196_v0, 0.0  ;;  %v1442_v1 = vsel %vm1038_vm2, %v1201_v31, 0.0 }
 0x12c   :  { %1506 = vst.msk [vmem:[%s2683_s2 + $0x90] sm:$0xff] %vm1487_vm3, %v1441_v49  ;;  %1507 = vst.msk [vmem:[%s2683_s2 + $0x98] sm:$0xff] %vm1487_vm3, %v1442_v1 }
 0x12e   :  { %v1206_v55 = vpop.permute.xlu1 %1205 }
 0x12f   :  { %v1443_v32 = vsel %vm1038_vm2, %v1206_v55, 0.0  ;;  %v1211_v5 = vpop.permute.xlu0 %1210 }
 0x130   :  { %1508 = vst.msk [vmem:[%s2683_s2 + $0xa0] sm:$0xff] %vm1487_vm3, %v1443_v32  ;;  %v1444_v2 = vsel %vm1038_vm2, %v1211_v5, 0.0 }
 0x131   :  { %1509 = vst.msk [vmem:[%s2683_s2 + $0xa8] sm:$0xff] %vm1487_vm3, %v1444_v2 }
 0x132   :  { %v1216_v48 = vpop.permute.xlu1 %1215 }
 0x133   :  { %v1445_v53 = vsel %vm1038_vm2, %v1216_v48, 0.0  ;;  %v1221_v39 = vpop.permute.xlu0 %1220 }
 0x134   :  { %1510 = vst.msk [vmem:[%s2683_s2 + $0xb0] sm:$0xff] %vm1487_vm3, %v1445_v53  ;;  %v1446_v9 = vsel %vm1038_vm2, %v1221_v39, 0.0 }
 0x135   :  { %1511 = vst.msk [vmem:[%s2683_s2 + $0xb8] sm:$0xff] %vm1487_vm3, %v1446_v9 }
 0x136   :  { %v1226_v40 = vpop.permute.xlu1 %1225 }
 0x137   :  { %v1447_v10 = vsel %vm1038_vm2, %v1226_v40, 0.0  ;;  %v1231_v21 = vpop.permute.xlu0 %1230 }
 0x138   :  { %1512 = vst.msk [vmem:[%s2683_s2 + $0xc0] sm:$0xff] %vm1487_vm3, %v1447_v10  ;;  %v1448_v45 = vsel %vm1038_vm2, %v1231_v21, 0.0 }
 0x139   :  { %1513 = vst.msk [vmem:[%s2683_s2 + $0xc8] sm:$0xff] %vm1487_vm3, %v1448_v45 }
 0x13a   :  { %v1236_v4 = vpop.permute.xlu1 %1235 }
 0x13b   :  { %v1449_v33 = vsel %vm1038_vm2, %v1236_v4, 0.0  ;;  %v1241_v56 = vpop.permute.xlu0 %1240 }
 0x13c   :  { %1514 = vst.msk [vmem:[%s2683_s2 + $0xd0] sm:$0xff] %vm1487_vm3, %v1449_v33  ;;  %v1450_v27 = vsel %vm1038_vm2, %v1241_v56, 0.0 }
 0x13d   :  { %1515 = vst.msk [vmem:[%s2683_s2 + $0xd8] sm:$0xff] %vm1487_vm3, %v1450_v27 }
 0x13e   :  { %v1246_v34 = vpop.permute.xlu1 %1245 }
 0x13f   :  { %v1451_v28 = vsel %vm1038_vm2, %v1246_v34, 0.0  ;;  %v1251_v59 = vpop.permute.xlu0 %1250 }
 0x140   :  { %1516 = vst.msk [vmem:[%s2683_s2 + $0xe0] sm:$0xff] %vm1487_vm3, %v1451_v28  ;;  %v1452_v18 = vsel %vm1038_vm2, %v1251_v59, 0.0 }
 0x141   :  { %1517 = vst.msk [vmem:[%s2683_s2 + $0xe8] sm:$0xff] %vm1487_vm3, %v1452_v18 }
 0x142   :  { %v1256_v13 = vpop.permute.xlu1 %1255 }
 0x143   :  { %v1453_v14 = vsel %vm1038_vm2, %v1256_v13, 0.0  ;;  %v1261_v3 = vpop.permute.xlu0 %1260 }
 0x144   :  { %1518 = vst.msk [vmem:[%s2683_s2 + $0xf0] sm:$0xff] %vm1487_vm3, %v1453_v14  ;;  %v1454_v63 = vsel %vm1038_vm2, %v1261_v3, 0.0 }
 0x145   :  { %1519 = vst.msk [vmem:[%s2683_s2 + $0xf8] sm:$0xff] %vm1487_vm3, %v1454_v63 }
 0x147   :  { %v1266_v6 = vpop.permute.xlu1 %1265 }
 0x148   :  { %v1271_v17 = vpop.permute.xlu0 %1270  ;;  %v1455_v51 = vsel %vm1038_vm2, %v1266_v6, 0.0 }
 0x149   :  { %v1456_v23 = vsel %vm1038_vm2, %v1271_v17, 0.0  ;;  %1520 = vst.msk [vmem:[%s2683_s2 + $0x100] sm:$0xff] %vm1487_vm3, %v1455_v51 }
 0x14a   :  { %1521 = vst.msk [vmem:[%s2683_s2 + $0x108] sm:$0xff] %vm1487_vm3, %v1456_v23 }
 0x14c   :  { %v1276_v24 = vpop.permute.xlu1 %1275  ;;  %v1281_v41 = vpop.permute.xlu0 %1280 }
 0x14d   :  { %v1457_v42 = vsel %vm1038_vm2, %v1276_v24, 0.0  ;;  %v1458_v57 = vsel %vm1038_vm2, %v1281_v41, 0.0 }
 0x14e   :  { %1522 = vst.msk [vmem:[%s2683_s2 + $0x110] sm:$0xff] %vm1487_vm3, %v1457_v42  ;;  %1523 = vst.msk [vmem:[%s2683_s2 + $0x118] sm:$0xff] %vm1487_vm3, %v1458_v57 }
 0x150   :  { %v1286_v58 = vpop.permute.xlu1 %1285  ;;  %v1291_v35 = vpop.permute.xlu0 %1290 }
 0x151   :  { %v1459_v50 = vsel %vm1038_vm2, %v1286_v58, 0.0  ;;  %v1460_v36 = vsel %vm1038_vm2, %v1291_v35, 0.0 }
 0x152   :  { %1524 = vst.msk [vmem:[%s2683_s2 + $0x120] sm:$0xff] %vm1487_vm3, %v1459_v50  ;;  %1525 = vst.msk [vmem:[%s2683_s2 + $0x128] sm:$0xff] %vm1487_vm3, %v1460_v36 }
 0x154   :  { %v1296_v8 = vpop.permute.xlu1 %1295  ;;  %v1301_v54 = vpop.permute.xlu0 %1300 }
 0x155   :  { %v1461_v44 = vsel %vm1038_vm2, %v1296_v8, 0.0  ;;  %v1462_v29 = vsel %vm1038_vm2, %v1301_v54, 0.0 }
 0x156   :  { %1526 = vst.msk [vmem:[%s2683_s2 + $0x130] sm:$0xff] %vm1487_vm3, %v1461_v44  ;;  %1527 = vst.msk [vmem:[%s2683_s2 + $0x138] sm:$0xff] %vm1487_vm3, %v1462_v29 }
 0x158   :  { %v1306_v30 = vpop.permute.xlu1 %1305  ;;  %v1311_v52 = vpop.permute.xlu0 %1310 }
 0x159   :  { %v1463_v7 = vsel %vm1038_vm2, %v1306_v30, 0.0  ;;  %v1464_v11 = vsel %vm1038_vm2, %v1311_v52, 0.0 }
 0x15a   :  { %1528 = vst.msk [vmem:[%s2683_s2 + $0x140] sm:$0xff] %vm1487_vm3, %v1463_v7  ;;  %1529 = vst.msk [vmem:[%s2683_s2 + $0x148] sm:$0xff] %vm1487_vm3, %v1464_v11 }
 0x15c   :  { %v1316_v19 = vpop.permute.xlu1 %1315  ;;  %v1321_v47 = vpop.permute.xlu0 %1320 }
 0x15d   :  { %v1465_v20 = vsel %vm1038_vm2, %v1316_v19, 0.0  ;;  %v1466_v43 = vsel %vm1038_vm2, %v1321_v47, 0.0 }
 0x15e   :  { %1530 = vst.msk [vmem:[%s2683_s2 + $0x150] sm:$0xff] %vm1487_vm3, %v1465_v20  ;;  %1531 = vst.msk [vmem:[%s2683_s2 + $0x158] sm:$0xff] %vm1487_vm3, %v1466_v43 }
 0x160   :  { %v1326_v12 = vpop.permute.xlu1 %1325  ;;  %v1331_v15 = vpop.permute.xlu0 %1330 }
 0x161   :  { %v1467_v16 = vsel %vm1038_vm2, %v1326_v12, 0.0  ;;  %v1468_v46 = vsel %vm1038_vm2, %v1331_v15, 0.0 }
 0x162   :  { %1532 = vst.msk [vmem:[%s2683_s2 + $0x160] sm:$0xff] %vm1487_vm3, %v1467_v16  ;;  %1533 = vst.msk [vmem:[%s2683_s2 + $0x168] sm:$0xff] %vm1487_vm3, %v1468_v46 }
 0x164   :  { %v1336_v37 = vpop.permute.xlu1 %1335  ;;  %v1341_v61 = vpop.permute.xlu0 %1340 }
 0x165   :  { %v1469_v25 = vsel %vm1038_vm2, %v1336_v37, 0.0  ;;  %v1470_v62 = vsel %vm1038_vm2, %v1341_v61, 0.0 }
 0x166   :  { %1534 = vst.msk [vmem:[%s2683_s2 + $0x170] sm:$0xff] %vm1487_vm3, %v1469_v25  ;;  %1535 = vst.msk [vmem:[%s2683_s2 + $0x178] sm:$0xff] %vm1487_vm3, %v1470_v62 }
 0x168   :  { %v1346_v38 = vpop.permute.xlu1 %1345  ;;  %v1351_v26 = vpop.permute.xlu0 %1350 }
 0x169   :  { %v1471_v60 = vsel %vm1038_vm2, %v1346_v38, 0.0  ;;  %v1472_v0 = vsel %vm1038_vm2, %v1351_v26, 0.0 }
 0x16a   :  { %1536 = vst.msk [vmem:[%s2683_s2 + $0x180] sm:$0xff] %vm1487_vm3, %v1471_v60  ;;  %1537 = vst.msk [vmem:[%s2683_s2 + $0x188] sm:$0xff] %vm1487_vm3, %v1472_v0 }
 0x16c   :  { %v1356_v49 = vpop.permute.xlu1 %1355  ;;  %v1361_v31 = vpop.permute.xlu0 %1360 }
 0x16d   :  { %v1473_v1 = vsel %vm1038_vm2, %v1356_v49, 0.0  ;;  %v1474_v55 = vsel %vm1038_vm2, %v1361_v31, 0.0 }
 0x16e   :  { %1538 = vst.msk [vmem:[%s2683_s2 + $0x190] sm:$0xff] %vm1487_vm3, %v1473_v1  ;;  %1539 = vst.msk [vmem:[%s2683_s2 + $0x198] sm:$0xff] %vm1487_vm3, %v1474_v55 }
 0x170   :  { %v1366_v32 = vpop.permute.xlu1 %1365  ;;  %v1371_v5 = vpop.permute.xlu0 %1370 }
 0x171   :  { %v1475_v2 = vsel %vm1038_vm2, %v1366_v32, 0.0  ;;  %v1476_v48 = vsel %vm1038_vm2, %v1371_v5, 0.0 }
 0x172   :  { %1540 = vst.msk [vmem:[%s2683_s2 + $0x1a0] sm:$0xff] %vm1487_vm3, %v1475_v2  ;;  %1541 = vst.msk [vmem:[%s2683_s2 + $0x1a8] sm:$0xff] %vm1487_vm3, %v1476_v48 }
 0x174   :  { %v1376_v53 = vpop.permute.xlu1 %1375  ;;  %v1381_v39 = vpop.permute.xlu0 %1380 }
 0x175   :  { %v1477_v9 = vsel %vm1038_vm2, %v1376_v53, 0.0  ;;  %v1478_v40 = vsel %vm1038_vm2, %v1381_v39, 0.0 }
 0x176   :  { %1542 = vst.msk [vmem:[%s2683_s2 + $0x1b0] sm:$0xff] %vm1487_vm3, %v1477_v9  ;;  %1543 = vst.msk [vmem:[%s2683_s2 + $0x1b8] sm:$0xff] %vm1487_vm3, %v1478_v40 }
 0x178   :  { %v1386_v10 = vpop.permute.xlu1 %1385  ;;  %v1391_v21 = vpop.permute.xlu0 %1390 }
 0x179   :  { %v1479_v45 = vsel %vm1038_vm2, %v1386_v10, 0.0  ;;  %v1480_v4 = vsel %vm1038_vm2, %v1391_v21, 0.0 }
 0x17a   :  { %1544 = vst.msk [vmem:[%s2683_s2 + $0x1c0] sm:$0xff] %vm1487_vm3, %v1479_v45  ;;  %1545 = vst.msk [vmem:[%s2683_s2 + $0x1c8] sm:$0xff] %vm1487_vm3, %v1480_v4 }
 0x17c   :  { %v1396_v33 = vpop.permute.xlu1 %1395  ;;  %v1401_v56 = vpop.permute.xlu0 %1400 }
 0x17d   :  { %v1481_v27 = vsel %vm1038_vm2, %v1396_v33, 0.0  ;;  %v1482_v34 = vsel %vm1038_vm2, %v1401_v56, 0.0 }
 0x17e   :  { %1546 = vst.msk [vmem:[%s2683_s2 + $0x1d0] sm:$0xff] %vm1487_vm3, %v1481_v27  ;;  %1547 = vst.msk [vmem:[%s2683_s2 + $0x1d8] sm:$0xff] %vm1487_vm3, %v1482_v34 }
 0x180   :  { %v1406_v28 = vpop.permute.xlu1 %1405  ;;  %v1411_v59 = vpop.permute.xlu0 %1410 }
 0x181   :  { %v1483_v18 = vsel %vm1038_vm2, %v1406_v28, 0.0  ;;  %v1484_v13 = vsel %vm1038_vm2, %v1411_v59, 0.0 }
 0x182   :  { %1548 = vst.msk [vmem:[%s2683_s2 + $0x1e0] sm:$0xff] %vm1487_vm3, %v1483_v18  ;;  %1549 = vst.msk [vmem:[%s2683_s2 + $0x1e8] sm:$0xff] %vm1487_vm3, %v1484_v13 }
 0x184   :  { %v1416_v14 = vpop.permute.xlu1 %1415  ;;  %v1421_v3 = vpop.permute.xlu0 %1420 }
 0x185   :  { %v1485_v63 = vsel %vm1038_vm2, %v1416_v14, 0.0  ;;  %v1486_v6 = vsel %vm1038_vm2, %v1421_v3, 0.0 }
 0x186   :  { %1550 = vst.msk [vmem:[%s2683_s2 + $0x1f0] sm:$0xff] %vm1487_vm3, %v1485_v63  ;;  %1551 = vst.msk [vmem:[%s2683_s2 + $0x1f8] sm:$0xff] %vm1487_vm3, %v1486_v6 }

</bundles_post_ra>
